<compile_context>
chip_gen: v6e
topology: v6e:2x2x1
jax: 0.10.0
libtpu: 0.0.40
codegen_flags: <defaults>
</compile_context>

<pallas_src>
import functools

import jax
import jax.numpy as jnp
from jax import lax
from jax.experimental import pallas as pl
from jax.experimental.pallas import tpu as pltpu


NEG_SLOPE = 0.01
GN_EPS = 1e-5


def _leaky_relu(x, slope=NEG_SLOPE):
    return jnp.where(x > 0, x, slope * x)


# ---------------------------------------------------------------------------
# Fused per-graph kernel (one grid step == one graph)
# ---------------------------------------------------------------------------
def _gm_embedder_kernel(a_ref, x_ref, w1_ref, wcat1_ref, wphi2_ref, wrho_ref,
                        p_ref, o_ref, *, hidden, rdim):
    f32 = jnp.float32
    bf16 = jnp.bfloat16
    H = hidden

    a = a_ref[...]                       # [N, N] bf16 normalized weighted adjacency
    x = x_ref[...]                       # [N, H] bf16 features (zero-padded columns)
    p = p_ref[...]                       # [9, H] f32 per-feature parameter table

    # Node-axis means as VALU/XLU sublane reductions (kept off the MXU so the
    # serialized small-matmul chain stays short); stats stay in f32.
    def node_mean(y):                    # [N, C] f32 -> [1, C] f32
        return jnp.mean(y, axis=0, keepdims=True)

    def graph_norm(y, alpha, gamma, beta):
        mean = node_mean(y)
        c = y - alpha * mean
        var = node_mean(c * c)
        return gamma * c * lax.rsqrt(var + GN_EPS) + beta

    # ---- layer 1: GraphConv (A @ X) @ W1 + GraphNorm + LeakyReLU --------------
    agg1 = jnp.dot(a, x, preferred_element_type=f32)                       # [N, H]
    y1 = jnp.dot(agg1.astype(bf16), w1_ref[...], preferred_element_type=f32)
    h1 = _leaky_relu(graph_norm(y1, p[0:1], p[1:2], p[2:3]))
    # dropout = identity (eval)

    # Fused matmul for the two consumers of h1:  h1 @ [Wphi1 | W2]  ->  [N, 2H]
    cat1 = jnp.dot(h1.astype(bf16), wcat1_ref[...], preferred_element_type=f32)
    phi1 = _leaky_relu(cat1[:, :H] + p[6:7])                               # readout1 phi
    xw2 = cat1[:, H:]                                                      # conv2 pre-agg

    # Batched node means: [ mean_nodes(h1) | mean(phi1) ] in one reduction.
    m1 = node_mean(jnp.concatenate([h1, phi1], axis=1))                    # [1, 2H]
    mn1, aggphi1 = m1[:, :H], m1[:, H:]

    # ---- layer 2: GraphConv A @ (h1 @ W2) + GraphNorm + LeakyReLU -------------
    y2 = jnp.dot(a, xw2.astype(bf16), preferred_element_type=f32)          # [N, H]
    h2 = _leaky_relu(graph_norm(y2, p[3:4], p[4:5], p[5:6]))
    phi2 = _leaky_relu(
        jnp.dot(h2.astype(bf16), wphi2_ref[...], preferred_element_type=f32) + p[7:8])
    m2 = node_mean(jnp.concatenate([h2, phi2], axis=1))                    # [1, 2H]
    mn2, aggphi2 = m2[:, :H], m2[:, H:]

    # ---- both readout rho linears via ONE block-diagonal matmul ---------------
    rho_in = jnp.concatenate([aggphi1, aggphi2], axis=1)                   # [1, 2H]
    rho = _leaky_relu(
        jnp.dot(rho_in.astype(bf16), wrho_ref[...], preferred_element_type=f32)
        + p[8:9, :2 * rdim])                                               # [1, 2R]
    r1, r2 = rho[:, :rdim], rho[:, rdim:2 * rdim]

    # ---- torch.hstack(r1, mean1, r2, mean2) + final LeakyReLU ------------------
    # One lane-dense (8, out_lanes) unmasked store; wrapper slices row 0.
    embed = 2 * (rdim + H)
    out_lanes = o_ref.shape[-1]
    row = _leaky_relu(jnp.concatenate([r1, mn1, r2, mn2], axis=1))         # [1, embed]
    if embed < out_lanes:
        row = jnp.concatenate([row, jnp.zeros((1, out_lanes - embed), f32)], axis=1)
    o_ref[...] = jnp.broadcast_to(row, o_ref.shape)


# ---------------------------------------------------------------------------
# One-time parameter packing (hoisted out of the per-call / jitted path)
# ---------------------------------------------------------------------------
def pack_gm_embedder_params(params, in_dim):
    hidden = params["conv2_w"].shape[0]
    assert hidden % 2 == 0, "hidden_dim must be even (readout_dim = hidden // 2)"
    rdim = hidden // 2

    w1 = jnp.pad(params["conv1_w"], ((0, hidden - in_dim), (0, 0)))            # [H, H]
    wcat1 = jnp.concatenate([params["ro1_wphi"], params["conv2_w"]], axis=1)   # [H, 2H]
    wphi2 = params["ro2_wphi"]                                                 # [H, H]
    wrho = jnp.zeros((2 * hidden, 2 * rdim), jnp.float32)                      # block-diag
    wrho = wrho.at[:hidden, :rdim].set(params["ro1_wrho"])
    wrho = wrho.at[hidden:, rdim:].set(params["ro2_wrho"])

    brho = jnp.concatenate([params["ro1_brho"], params["ro2_brho"]], axis=1)
    brho = jnp.pad(brho, ((0, 0), (0, hidden - 2 * rdim)))
    p = jnp.concatenate([
        params["gn1_alpha"], params["gn1_gamma"], params["gn1_beta"],
        params["gn2_alpha"], params["gn2_gamma"], params["gn2_beta"],
        params["ro1_bphi"], params["ro2_bphi"], brho,
    ], axis=0).astype(jnp.float32)                                             # [9, H]

    packed = {
        "w1": w1.astype(jnp.bfloat16),
        "wcat1": wcat1.astype(jnp.bfloat16),
        "wphi2": wphi2.astype(jnp.bfloat16),
        "wrho": wrho.astype(jnp.bfloat16),
        "p": p,
    }
    return jax.block_until_ready(packed)   # materialize once; nothing left per call


# ---------------------------------------------------------------------------
# GMEmbedder forward, batched over graphs: a_hat [G,N,N], features [G,N,F]
# ---------------------------------------------------------------------------
@jax.jit
def gm_embedder_forward(packed, a_hat, features):
    g, n, _ = a_hat.shape
    hidden = packed["w1"].shape[1]
    rdim = packed["wrho"].shape[1] // 2
    in_dim = features.shape[-1]
    n_prows = packed["p"].shape[0]
    embed_dim = 2 * (rdim + hidden)
    out_lanes = max(128, ((embed_dim + 127) // 128) * 128)

    # Per-call work: only cast A_hat and pad/cast features (weights are pre-packed).
    a_bf16 = a_hat.astype(jnp.bfloat16)
    x_pad = jnp.pad(features, ((0, 0), (0, 0), (0, hidden - in_dim))).astype(jnp.bfloat16)

    kernel = functools.partial(_gm_embedder_kernel, hidden=hidden, rdim=rdim)

    flops = g * (4 * n * n * hidden + 8 * n * hidden * hidden)
    bytes_accessed = (a_bf16.size * 2 + x_pad.size * 2
                      + sum(packed[k].size * 2 for k in ("w1", "wcat1", "wphi2", "wrho"))
                      + packed["p"].size * 4 + g * 8 * out_lanes * 4)

    grid_spec = pltpu.PrefetchScalarGridSpec(
        num_scalar_prefetch=0,
        grid=(g,),
        in_specs=[
            pl.BlockSpec((pl.Squeezed(), n, n), lambda i: (i, 0, 0)),        # A_hat[g]
            pl.BlockSpec((pl.Squeezed(), n, hidden), lambda i: (i, 0, 0)),   # X[g]
            pl.BlockSpec((hidden, hidden), lambda i: (0, 0)),                # W1 (resident)
            pl.BlockSpec((hidden, 2 * hidden), lambda i: (0, 0)),            # [Wphi1 | W2]
            pl.BlockSpec((hidden, hidden), lambda i: (0, 0)),                # Wphi2
            pl.BlockSpec((2 * hidden, 2 * rdim), lambda i: (0, 0)),          # blkdiag Wrho
            pl.BlockSpec((n_prows, hidden), lambda i: (0, 0)),               # param table
        ],
        out_specs=pl.BlockSpec((pl.Squeezed(), 8, out_lanes), lambda i: (i, 0, 0)),
    )

    out = pl.pallas_call(
        kernel,
        out_shape=jax.ShapeDtypeStruct((g, 8, out_lanes), jnp.float32),
        grid_spec=grid_spec,
        compiler_params=pltpu.CompilerParams(dimension_semantics=("parallel",)),
        cost_estimate=pl.CostEstimate(flops=flops, transcendentals=g * 4 * hidden,
                                      bytes_accessed=bytes_accessed),
    )(a_bf16, x_pad, packed["w1"], packed["wcat1"], packed["wphi2"],
      packed["wrho"], packed["p"])
    return out[:, 0, :embed_dim]


# ---------------------------------------------------------------------------
# Pure-JAX f32 reference (same assumed semantics), for tolerance checking
# ---------------------------------------------------------------------------
def gm_embedder_reference(params, a_hat, features):
    def lrelu(v):
        return jnp.where(v > 0, v, NEG_SLOPE * v)

    def gnorm(v, alpha, gamma, beta):
        m = jnp.mean(v, axis=0, keepdims=True)
        c = v - alpha * m
        var = jnp.mean(c * c, axis=0, keepdims=True)
        return gamma * c / jnp.sqrt(var + GN_EPS) + beta

    def readout(h, wphi, bphi, wrho, brho):
        phi = lrelu(h @ wphi + bphi)
        return lrelu(jnp.mean(phi, axis=0, keepdims=True) @ wrho + brho)

    def one_graph(a, x):
        h1 = lrelu(gnorm(a @ x @ params["conv1_w"],
                         params["gn1_alpha"], params["gn1_gamma"], params["gn1_beta"]))
        r1 = readout(h1, params["ro1_wphi"], params["ro1_bphi"],
                     params["ro1_wrho"], params["ro1_brho"])
        mn1 = jnp.mean(h1, axis=0, keepdims=True)
        h2 = lrelu(gnorm(a @ (h1 @ params["conv2_w"]),
                         params["gn2_alpha"], params["gn2_gamma"], params["gn2_beta"]))
        r2 = readout(h2, params["ro2_wphi"], params["ro2_bphi"],
                     params["ro2_wrho"], params["ro2_brho"])
        mn2 = jnp.mean(h2, axis=0, keepdims=True)
        return lrelu(jnp.concatenate([r1, mn1, r2, mn2], axis=1))[0]

    return jax.vmap(one_graph)(a_hat, features)


# ---------------------------------------------------------------------------
# Parameter construction (deterministic, mirrors the PyTorch __init__ inits)
# ---------------------------------------------------------------------------
def kaiming_uniform(key, fan_in, fan_out, a=NEG_SLOPE):
    gain = jnp.sqrt(2.0 / (1.0 + a * a))
    bound = gain * jnp.sqrt(3.0 / fan_in)
    return jax.random.uniform(key, (fan_in, fan_out), jnp.float32, -bound, bound)


def linear_init(key, fan_in, fan_out):
    kw, kb = jax.random.split(key)
    bound = 1.0 / jnp.sqrt(fan_in)
    w = jax.random.uniform(kw, (fan_in, fan_out), jnp.float32, -bound, bound)
    b = jax.random.uniform(kb, (1, fan_out), jnp.float32, -bound, bound)
    return w, b


def init_gm_embedder(key, in_dim, hidden_dim):
    ks = jax.random.split(key, 6)
    readout_dim = hidden_dim // 2
    params = {
        "conv1_w": kaiming_uniform(ks[0], in_dim, hidden_dim),
        "conv2_w": kaiming_uniform(ks[1], hidden_dim, hidden_dim),
        "gn1_alpha": jnp.ones((1, hidden_dim), jnp.float32),
        "gn1_gamma": jnp.ones((1, hidden_dim), jnp.float32),
        "gn1_beta": jnp.zeros((1, hidden_dim), jnp.float32),
        "gn2_alpha": jnp.ones((1, hidden_dim), jnp.float32),
        "gn2_gamma": jnp.ones((1, hidden_dim), jnp.float32),
        "gn2_beta": jnp.zeros((1, hidden_dim), jnp.float32),
    }
    params["ro1_wphi"], params["ro1_bphi"] = linear_init(ks[2], hidden_dim, hidden_dim)
    params["ro1_wrho"], params["ro1_brho"] = linear_init(ks[3], hidden_dim, readout_dim)
    params["ro2_wphi"], params["ro2_bphi"] = linear_init(ks[4], hidden_dim, hidden_dim)
    params["ro2_wrho"], params["ro2_brho"] = linear_init(ks[5], hidden_dim, readout_dim)
    return params


# ---------------------------------------------------------------------------
# Graph construction helper (dense normalized weighted adjacency)
# ---------------------------------------------------------------------------
def build_normalized_adjacency(key, n_nodes):
    k_mask, k_w = jax.random.split(key)
    mask = (jax.random.uniform(k_mask, (n_nodes, n_nodes)) < 0.1).astype(jnp.float32)
    mask = jnp.maximum(mask, jnp.eye(n_nodes, dtype=jnp.float32))   # self-loops
    edge_w = jax.random.uniform(k_w, (n_nodes, n_nodes), jnp.float32, 0.5, 1.5)
    a = mask * edge_w                                               # a[i, j]: edge j -> i
    d_in = jnp.clip(jnp.sum(a, axis=1), 1e-6)                       # [N]
    d_out = jnp.clip(jnp.sum(a, axis=0), 1e-6)                      # [N]
    a_hat = a / jnp.sqrt(d_in)[:, None] / jnp.sqrt(d_out)[None, :]
    return a_hat


if __name__ == "__main__":
    N_GRAPHS = 2
    N_NODES = 128
    IN_DIM = 8
    HIDDEN = 32

    key = jax.random.PRNGKey(0)
    k_graph, k_feat, k_params = jax.random.split(key, 3)

    graph_keys = jax.random.split(k_graph, N_GRAPHS)
    a_hat = jnp.stack([build_normalized_adjacency(graph_keys[i], N_NODES)
                       for i in range(N_GRAPHS)])                         # [G, 128, 128]
    features = jax.random.normal(k_feat, (N_GRAPHS, N_NODES, IN_DIM),
                                 jnp.float32)                             # [G, 128, 8]
    params = init_gm_embedder(k_params, IN_DIM, HIDDEN)
    packed = pack_gm_embedder_params(params, IN_DIM)   # one-time, outside the hot path

    out = gm_embedder_forward(packed, a_hat, features)
    out = jax.block_until_ready(out)

    embed_dim = 2 * (HIDDEN // 2 + HIDDEN)
    assert out.shape == (N_GRAPHS, embed_dim), out.shape
    assert bool(jnp.all(jnp.isfinite(out)))

    ref = gm_embedder_reference(params, a_hat, features)
    assert float(jnp.max(jnp.abs(out - ref))) < 0.1, "bf16-MXU vs f32-ref mismatch"

    print("KERNEL_OK")
</pallas_src>

<mosaic_0001>
module attributes {stable_mosaic.version = 11 : i64} {
  func.func @_gm_embedder_kernel(%arg0: i32, %arg1: memref<1x128x128xbf16, #tpu.memory_space<vmem>>, %arg2: memref<1x128x32xbf16, #tpu.memory_space<vmem>>, %arg3: memref<32x32xbf16, #tpu.memory_space<vmem>>, %arg4: memref<32x64xbf16, #tpu.memory_space<vmem>>, %arg5: memref<32x32xbf16, #tpu.memory_space<vmem>>, %arg6: memref<64x32xbf16, #tpu.memory_space<vmem>>, %arg7: memref<9x32xf32, #tpu.memory_space<vmem>>, %arg8: memref<1x8x128xf32, #tpu.memory_space<vmem>>) attributes {dimension_semantics = [#tpu.dimension_semantics<parallel>], iteration_bounds = array<i64: 2>, scalar_prefetch = 0 : i64, scratch_operands = 0 : i64, tpu.core_type = #tpu.core_type<tc>, window_params = [{transform_indices = @transform_0, window_bounds = array<i64: 1, 128, 128>}, {transform_indices = @transform_1, window_bounds = array<i64: 1, 128, 32>}, {pipeline_mode = #tpu.pipeline_mode<synchronous>, transform_indices = @transform_2, window_bounds = array<i64: 32, 32>}, {pipeline_mode = #tpu.pipeline_mode<synchronous>, transform_indices = @transform_3, window_bounds = array<i64: 32, 64>}, {pipeline_mode = #tpu.pipeline_mode<synchronous>, transform_indices = @transform_4, window_bounds = array<i64: 32, 32>}, {pipeline_mode = #tpu.pipeline_mode<synchronous>, transform_indices = @transform_5, window_bounds = array<i64: 64, 32>}, {pipeline_mode = #tpu.pipeline_mode<synchronous>, transform_indices = @transform_6, window_bounds = array<i64: 9, 32>}, {transform_indices = @transform_7, window_bounds = array<i64: 1, 8, 128>}]} {
    %c0 = arith.constant 0 : index
    %c0_0 = arith.constant 0 : index
    %c0_1 = arith.constant 0 : index
    %0 = vector.load %arg1[%c0, %c0_0, %c0_1] : memref<1x128x128xbf16, #tpu.memory_space<vmem>>, vector<1x128x128xbf16>
    %1 = vector.shape_cast %0 : vector<1x128x128xbf16> to vector<128x128xbf16>
    %c0_2 = arith.constant 0 : index
    %c0_3 = arith.constant 0 : index
    %c0_4 = arith.constant 0 : index
    %2 = vector.load %arg2[%c0_2, %c0_3, %c0_4] : memref<1x128x32xbf16, #tpu.memory_space<vmem>>, vector<1x128x32xbf16>
    %3 = vector.shape_cast %2 : vector<1x128x32xbf16> to vector<128x32xbf16>
    %c0_5 = arith.constant 0 : index
    %c0_6 = arith.constant 0 : index
    %4 = vector.load %arg7[%c0_5, %c0_6] : memref<9x32xf32, #tpu.memory_space<vmem>>, vector<9x32xf32>
    %cst = arith.constant dense<0.000000e+00> : vector<128x32xf32>
    %5 = tpu.matmul %1, %3, %cst {dimension_numbers = #tpu.dot_dimension_numbers<[1], [0], [0], [1], [0, 0, 1, 1], [], []>} : vector<128x128xbf16>, vector<128x32xbf16>, vector<128x32xf32> -> vector<128x32xf32>
    %6 = arith.truncf %5 : vector<128x32xf32> to vector<128x32xbf16>
    %c0_7 = arith.constant 0 : index
    %c0_8 = arith.constant 0 : index
    %7 = vector.load %arg3[%c0_7, %c0_8] : memref<32x32xbf16, #tpu.memory_space<vmem>>, vector<32x32xbf16>
    %cst_9 = arith.constant dense<0.000000e+00> : vector<128x32xf32>
    %8 = tpu.matmul %6, %7, %cst_9 {dimension_numbers = #tpu.dot_dimension_numbers<[1], [0], [0], [1], [0, 0, 1, 1], [], []>} : vector<128x32xbf16>, vector<32x32xbf16>, vector<128x32xf32> -> vector<128x32xf32>
    %9 = vector.extract_strided_slice %4 {offsets = [0, 0], sizes = [1, 32], strides = [1, 1]} : vector<9x32xf32> to vector<1x32xf32>
    %10 = vector.extract_strided_slice %4 {offsets = [1, 0], sizes = [1, 32], strides = [1, 1]} : vector<9x32xf32> to vector<1x32xf32>
    %11 = vector.extract_strided_slice %4 {offsets = [2, 0], sizes = [1, 32], strides = [1, 1]} : vector<9x32xf32> to vector<1x32xf32>
    %cst_10 = arith.constant dense<0.000000e+00> : vector<32xf32>
    %12 = vector.multi_reduction <add>, %8, %cst_10 [0] : vector<128x32xf32> to vector<32xf32>
    %13 = vector.shape_cast %12 : vector<32xf32> to vector<1x32xf32>
    %cst_11 = arith.constant 1.280000e+02 : f32
    %14 = vector.broadcast %cst_11 : f32 to vector<1x32xf32>
    %15 = arith.divf %13, %14 : vector<1x32xf32>
    %16 = arith.mulf %9, %15 : vector<1x32xf32>
    %17 = vector.broadcast %16 : vector<1x32xf32> to vector<128x32xf32>
    %18 = arith.subf %8, %17 : vector<128x32xf32>
    %19 = arith.mulf %18, %18 : vector<128x32xf32>
    %cst_12 = arith.constant dense<0.000000e+00> : vector<32xf32>
    %20 = vector.multi_reduction <add>, %19, %cst_12 [0] : vector<128x32xf32> to vector<32xf32>
    %21 = vector.shape_cast %20 : vector<32xf32> to vector<1x32xf32>
    %cst_13 = arith.constant 1.280000e+02 : f32
    %22 = vector.broadcast %cst_13 : f32 to vector<1x32xf32>
    %23 = arith.divf %21, %22 : vector<1x32xf32>
    %24 = vector.broadcast %10 : vector<1x32xf32> to vector<128x32xf32>
    %25 = arith.mulf %24, %18 : vector<128x32xf32>
    %cst_14 = arith.constant 9.99999974E-6 : f32
    %26 = vector.broadcast %cst_14 : f32 to vector<1x32xf32>
    %27 = arith.addf %23, %26 : vector<1x32xf32>
    %28 = math.rsqrt %27 : vector<1x32xf32>
    %29 = vector.broadcast %28 : vector<1x32xf32> to vector<128x32xf32>
    %30 = arith.mulf %25, %29 : vector<128x32xf32>
    %31 = vector.broadcast %11 : vector<1x32xf32> to vector<128x32xf32>
    %32 = arith.addf %30, %31 : vector<128x32xf32>
    %cst_15 = arith.constant 0.000000e+00 : f32
    %33 = vector.broadcast %cst_15 : f32 to vector<128x32xf32>
    %34 = arith.cmpf ogt, %32, %33 : vector<128x32xf32>
    %cst_16 = arith.constant 0.00999999977 : f32
    %35 = vector.broadcast %cst_16 : f32 to vector<128x32xf32>
    %36 = arith.mulf %35, %32 : vector<128x32xf32>
    %37 = arith.select %34, %32, %36 : vector<128x32xi1>, vector<128x32xf32>
    %38 = arith.truncf %37 : vector<128x32xf32> to vector<128x32xbf16>
    %c0_17 = arith.constant 0 : index
    %c0_18 = arith.constant 0 : index
    %39 = vector.load %arg4[%c0_17, %c0_18] : memref<32x64xbf16, #tpu.memory_space<vmem>>, vector<32x64xbf16>
    %cst_19 = arith.constant dense<0.000000e+00> : vector<128x64xf32>
    %40 = tpu.matmul %38, %39, %cst_19 {dimension_numbers = #tpu.dot_dimension_numbers<[1], [0], [0], [1], [0, 0, 1, 1], [], []>} : vector<128x32xbf16>, vector<32x64xbf16>, vector<128x64xf32> -> vector<128x64xf32>
    %41 = vector.extract_strided_slice %40 {offsets = [0, 0], sizes = [128, 32], strides = [1, 1]} : vector<128x64xf32> to vector<128x32xf32>
    %42 = vector.extract_strided_slice %4 {offsets = [6, 0], sizes = [1, 32], strides = [1, 1]} : vector<9x32xf32> to vector<1x32xf32>
    %43 = vector.broadcast %42 : vector<1x32xf32> to vector<128x32xf32>
    %44 = arith.addf %41, %43 : vector<128x32xf32>
    %cst_20 = arith.constant 0.000000e+00 : f32
    %45 = vector.broadcast %cst_20 : f32 to vector<128x32xf32>
    %46 = arith.cmpf ogt, %44, %45 : vector<128x32xf32>
    %cst_21 = arith.constant 0.00999999977 : f32
    %47 = vector.broadcast %cst_21 : f32 to vector<128x32xf32>
    %48 = arith.mulf %47, %44 : vector<128x32xf32>
    %49 = arith.select %46, %44, %48 : vector<128x32xi1>, vector<128x32xf32>
    %50 = vector.extract_strided_slice %40 {offsets = [0, 32], sizes = [128, 32], strides = [1, 1]} : vector<128x64xf32> to vector<128x32xf32>
    %51 = tpu.concatenate %37, %49 in 1 : vector<128x32xf32>, vector<128x32xf32> -> vector<128x64xf32>
    %cst_22 = arith.constant dense<0.000000e+00> : vector<64xf32>
    %52 = vector.multi_reduction <add>, %51, %cst_22 [0] : vector<128x64xf32> to vector<64xf32>
    %53 = vector.shape_cast %52 : vector<64xf32> to vector<1x64xf32>
    %cst_23 = arith.constant 1.280000e+02 : f32
    %54 = vector.broadcast %cst_23 : f32 to vector<1x64xf32>
    %55 = arith.divf %53, %54 : vector<1x64xf32>
    %56 = vector.extract_strided_slice %55 {offsets = [0, 0], sizes = [1, 32], strides = [1, 1]} : vector<1x64xf32> to vector<1x32xf32>
    %57 = vector.extract_strided_slice %55 {offsets = [0, 32], sizes = [1, 32], strides = [1, 1]} : vector<1x64xf32> to vector<1x32xf32>
    %58 = arith.truncf %50 : vector<128x32xf32> to vector<128x32xbf16>
    %cst_24 = arith.constant dense<0.000000e+00> : vector<128x32xf32>
    %59 = tpu.matmul %1, %58, %cst_24 {dimension_numbers = #tpu.dot_dimension_numbers<[1], [0], [0], [1], [0, 0, 1, 1], [], []>} : vector<128x128xbf16>, vector<128x32xbf16>, vector<128x32xf32> -> vector<128x32xf32>
    %60 = vector.extract_strided_slice %4 {offsets = [3, 0], sizes = [1, 32], strides = [1, 1]} : vector<9x32xf32> to vector<1x32xf32>
    %61 = vector.extract_strided_slice %4 {offsets = [4, 0], sizes = [1, 32], strides = [1, 1]} : vector<9x32xf32> to vector<1x32xf32>
    %62 = vector.extract_strided_slice %4 {offsets = [5, 0], sizes = [1, 32], strides = [1, 1]} : vector<9x32xf32> to vector<1x32xf32>
    %cst_25 = arith.constant dense<0.000000e+00> : vector<32xf32>
    %63 = vector.multi_reduction <add>, %59, %cst_25 [0] : vector<128x32xf32> to vector<32xf32>
    %64 = vector.shape_cast %63 : vector<32xf32> to vector<1x32xf32>
    %cst_26 = arith.constant 1.280000e+02 : f32
    %65 = vector.broadcast %cst_26 : f32 to vector<1x32xf32>
    %66 = arith.divf %64, %65 : vector<1x32xf32>
    %67 = arith.mulf %60, %66 : vector<1x32xf32>
    %68 = vector.broadcast %67 : vector<1x32xf32> to vector<128x32xf32>
    %69 = arith.subf %59, %68 : vector<128x32xf32>
    %70 = arith.mulf %69, %69 : vector<128x32xf32>
    %cst_27 = arith.constant dense<0.000000e+00> : vector<32xf32>
    %71 = vector.multi_reduction <add>, %70, %cst_27 [0] : vector<128x32xf32> to vector<32xf32>
    %72 = vector.shape_cast %71 : vector<32xf32> to vector<1x32xf32>
    %cst_28 = arith.constant 1.280000e+02 : f32
    %73 = vector.broadcast %cst_28 : f32 to vector<1x32xf32>
    %74 = arith.divf %72, %73 : vector<1x32xf32>
    %75 = vector.broadcast %61 : vector<1x32xf32> to vector<128x32xf32>
    %76 = arith.mulf %75, %69 : vector<128x32xf32>
    %cst_29 = arith.constant 9.99999974E-6 : f32
    %77 = vector.broadcast %cst_29 : f32 to vector<1x32xf32>
    %78 = arith.addf %74, %77 : vector<1x32xf32>
    %79 = math.rsqrt %78 : vector<1x32xf32>
    %80 = vector.broadcast %79 : vector<1x32xf32> to vector<128x32xf32>
    %81 = arith.mulf %76, %80 : vector<128x32xf32>
    %82 = vector.broadcast %62 : vector<1x32xf32> to vector<128x32xf32>
    %83 = arith.addf %81, %82 : vector<128x32xf32>
    %cst_30 = arith.constant 0.000000e+00 : f32
    %84 = vector.broadcast %cst_30 : f32 to vector<128x32xf32>
    %85 = arith.cmpf ogt, %83, %84 : vector<128x32xf32>
    %cst_31 = arith.constant 0.00999999977 : f32
    %86 = vector.broadcast %cst_31 : f32 to vector<128x32xf32>
    %87 = arith.mulf %86, %83 : vector<128x32xf32>
    %88 = arith.select %85, %83, %87 : vector<128x32xi1>, vector<128x32xf32>
    %89 = arith.truncf %88 : vector<128x32xf32> to vector<128x32xbf16>
    %c0_32 = arith.constant 0 : index
    %c0_33 = arith.constant 0 : index
    %90 = vector.load %arg5[%c0_32, %c0_33] : memref<32x32xbf16, #tpu.memory_space<vmem>>, vector<32x32xbf16>
    %cst_34 = arith.constant dense<0.000000e+00> : vector<128x32xf32>
    %91 = tpu.matmul %89, %90, %cst_34 {dimension_numbers = #tpu.dot_dimension_numbers<[1], [0], [0], [1], [0, 0, 1, 1], [], []>} : vector<128x32xbf16>, vector<32x32xbf16>, vector<128x32xf32> -> vector<128x32xf32>
    %92 = vector.extract_strided_slice %4 {offsets = [7, 0], sizes = [1, 32], strides = [1, 1]} : vector<9x32xf32> to vector<1x32xf32>
    %93 = vector.broadcast %92 : vector<1x32xf32> to vector<128x32xf32>
    %94 = arith.addf %91, %93 : vector<128x32xf32>
    %cst_35 = arith.constant 0.000000e+00 : f32
    %95 = vector.broadcast %cst_35 : f32 to vector<128x32xf32>
    %96 = arith.cmpf ogt, %94, %95 : vector<128x32xf32>
    %cst_36 = arith.constant 0.00999999977 : f32
    %97 = vector.broadcast %cst_36 : f32 to vector<128x32xf32>
    %98 = arith.mulf %97, %94 : vector<128x32xf32>
    %99 = arith.select %96, %94, %98 : vector<128x32xi1>, vector<128x32xf32>
    %100 = tpu.concatenate %88, %99 in 1 : vector<128x32xf32>, vector<128x32xf32> -> vector<128x64xf32>
    %cst_37 = arith.constant dense<0.000000e+00> : vector<64xf32>
    %101 = vector.multi_reduction <add>, %100, %cst_37 [0] : vector<128x64xf32> to vector<64xf32>
    %102 = vector.shape_cast %101 : vector<64xf32> to vector<1x64xf32>
    %cst_38 = arith.constant 1.280000e+02 : f32
    %103 = vector.broadcast %cst_38 : f32 to vector<1x64xf32>
    %104 = arith.divf %102, %103 : vector<1x64xf32>
    %105 = vector.extract_strided_slice %104 {offsets = [0, 0], sizes = [1, 32], strides = [1, 1]} : vector<1x64xf32> to vector<1x32xf32>
    %106 = vector.extract_strided_slice %104 {offsets = [0, 32], sizes = [1, 32], strides = [1, 1]} : vector<1x64xf32> to vector<1x32xf32>
    %107 = tpu.concatenate %57, %106 in 1 : vector<1x32xf32>, vector<1x32xf32> -> vector<1x64xf32>
    %108 = arith.truncf %107 : vector<1x64xf32> to vector<1x64xbf16>
    %c0_39 = arith.constant 0 : index
    %c0_40 = arith.constant 0 : index
    %109 = vector.load %arg6[%c0_39, %c0_40] : memref<64x32xbf16, #tpu.memory_space<vmem>>, vector<64x32xbf16>
    %cst_41 = arith.constant dense<0.000000e+00> : vector<1x32xf32>
    %110 = tpu.matmul %108, %109, %cst_41 {dimension_numbers = #tpu.dot_dimension_numbers<[1], [0], [0], [1], [0, 0, 1, 1], [], []>} : vector<1x64xbf16>, vector<64x32xbf16>, vector<1x32xf32> -> vector<1x32xf32>
    %111 = vector.extract_strided_slice %4 {offsets = [8, 0], sizes = [1, 32], strides = [1, 1]} : vector<9x32xf32> to vector<1x32xf32>
    %112 = arith.addf %110, %111 : vector<1x32xf32>
    %cst_42 = arith.constant 0.000000e+00 : f32
    %113 = vector.broadcast %cst_42 : f32 to vector<1x32xf32>
    %114 = arith.cmpf ogt, %112, %113 : vector<1x32xf32>
    %cst_43 = arith.constant 0.00999999977 : f32
    %115 = vector.broadcast %cst_43 : f32 to vector<1x32xf32>
    %116 = arith.mulf %115, %112 : vector<1x32xf32>
    %117 = arith.select %114, %112, %116 : vector<1x32xi1>, vector<1x32xf32>
    %118 = vector.extract_strided_slice %117 {offsets = [0, 0], sizes = [1, 16], strides = [1, 1]} : vector<1x32xf32> to vector<1x16xf32>
    %119 = vector.extract_strided_slice %117 {offsets = [0, 16], sizes = [1, 16], strides = [1, 1]} : vector<1x32xf32> to vector<1x16xf32>
    %120 = tpu.concatenate %118, %56, %119, %105 in 1 : vector<1x16xf32>, vector<1x32xf32>, vector<1x16xf32>, vector<1x32xf32> -> vector<1x96xf32>
    %cst_44 = arith.constant 0.000000e+00 : f32
    %121 = vector.broadcast %cst_44 : f32 to vector<1x96xf32>
    %122 = arith.cmpf ogt, %120, %121 : vector<1x96xf32>
    %cst_45 = arith.constant 0.00999999977 : f32
    %123 = vector.broadcast %cst_45 : f32 to vector<1x96xf32>
    %124 = arith.mulf %123, %120 : vector<1x96xf32>
    %125 = arith.select %122, %120, %124 : vector<1x96xi1>, vector<1x96xf32>
    %cst_46 = arith.constant 0.000000e+00 : f32
    %126 = vector.broadcast %cst_46 : f32 to vector<1x32xf32>
    %127 = tpu.concatenate %125, %126 in 1 : vector<1x96xf32>, vector<1x32xf32> -> vector<1x128xf32>
    %128 = vector.shape_cast %127 : vector<1x128xf32> to vector<1x128xf32>
    %129 = vector.broadcast %128 : vector<1x128xf32> to vector<8x128xf32>
    %c0_47 = arith.constant 0 : index
    %c0_48 = arith.constant 0 : index
    %c0_49 = arith.constant 0 : index
    %130 = vector.load %arg8[%c0_47, %c0_48, %c0_49] : memref<1x8x128xf32, #tpu.memory_space<vmem>>, vector<1x8x128xf32>
    %131 = vector.shape_cast %130 : vector<1x8x128xf32> to vector<8x128xf32>
    %132 = vector.shape_cast %129 : vector<8x128xf32> to vector<1x8x128xf32>
    tpu.vector_store %arg8[%c0_47, %c0_48, %c0_49], %132 {strides = array<i32>} : memref<1x8x128xf32, #tpu.memory_space<vmem>>, vector<1x8x128xf32>,
    return
  }
  func.func @transform_0(%arg0: i32) -> (i32, i32, i32) {
    %c0_i32 = arith.constant 0 : i32
    %c0_i32_0 = arith.constant 0 : i32
    %c0_i32_1 = arith.constant 0 : i32
    return %arg0, %c0_i32, %c0_i32_0 : i32, i32, i32
  }
  func.func @transform_1(%arg0: i32) -> (i32, i32, i32) {
    %c0_i32 = arith.constant 0 : i32
    %c0_i32_0 = arith.constant 0 : i32
    %c0_i32_1 = arith.constant 0 : i32
    return %arg0, %c0_i32, %c0_i32_0 : i32, i32, i32
  }
  func.func @transform_2(%arg0: i32) -> (i32, i32) {
    %c0_i32 = arith.constant 0 : i32
    %c0_i32_0 = arith.constant 0 : i32
    %c0_i32_1 = arith.constant 0 : i32
    return %c0_i32, %c0_i32_0 : i32, i32
  }
  func.func @transform_3(%arg0: i32) -> (i32, i32) {
    %c0_i32 = arith.constant 0 : i32
    %c0_i32_0 = arith.constant 0 : i32
    %c0_i32_1 = arith.constant 0 : i32
    return %c0_i32, %c0_i32_0 : i32, i32
  }
  func.func @transform_4(%arg0: i32) -> (i32, i32) {
    %c0_i32 = arith.constant 0 : i32
    %c0_i32_0 = arith.constant 0 : i32
    %c0_i32_1 = arith.constant 0 : i32
    return %c0_i32, %c0_i32_0 : i32, i32
  }
  func.func @transform_5(%arg0: i32) -> (i32, i32) {
    %c0_i32 = arith.constant 0 : i32
    %c0_i32_0 = arith.constant 0 : i32
    %c0_i32_1 = arith.constant 0 : i32
    return %c0_i32, %c0_i32_0 : i32, i32
  }
  func.func @transform_6(%arg0: i32) -> (i32, i32) {
    %c0_i32 = arith.constant 0 : i32
    %c0_i32_0 = arith.constant 0 : i32
    %c0_i32_1 = arith.constant 0 : i32
    return %c0_i32, %c0_i32_0 : i32, i32
  }
  func.func @transform_7(%arg0: i32) -> (i32, i32, i32) {
    %c0_i32 = arith.constant 0 : i32
    %c0_i32_0 = arith.constant 0 : i32
    %c0_i32_1 = arith.constant 0 : i32
    return %arg0, %c0_i32, %c0_i32_0 : i32, i32, i32
  }
}

</mosaic_0001>

<bundles_post_ra>
// kernel: gm_embedder_forward.1
= control target key start
LH: loop header
LB: loop body
LE: loop exit
PB: predicated region body
PF: predicated region fallthrough
CT: control target
= control target key end

     0   :  { %s2436_s24 = smov 0   ;;  %s3264_s0 = inlined_call_operand.vmem [shape: bf16[2,128,128], index: 0, kind: input, shape index: {}]   ;;  %s3265_s1 = inlined_call_operand.vmem [shape: bf16[2,128,32], index: 1, kind: input, shape index: {}]   ;;  %s3266_s2 = inlined_call_operand.vmem [shape: bf16[32,32], index: 2, kind: input, shape index: {}]   ;;  %s3267_s3 = inlined_call_operand.vmem [shape: bf16[32,64], index: 3, kind: input, shape index: {}]   ;;  %s3268_s4 = inlined_call_operand.vmem [shape: bf16[32,32], index: 4, kind: input, shape index: {}]   ;;  %s3269_s5 = inlined_call_operand.vmem [shape: bf16[64,32], index: 5, kind: input, shape index: {}]   ;;  %s3270_s6 = inlined_call_operand.vmem [shape: f32[9,32], index: 6, kind: input, shape index: {}]   ;;  %s3271_s7 = inlined_call_operand.vmem [shape: f32[2,8,128], index: 7, kind: output, shape index: {}]  }
   0x1 LB: > { %s2069_s25 = sadd.s32 4294967295, %s2388_s24   ;;  %p2073_p0 = scmp.ge.s32.totalorder %s2388_s24, 1  ;;  %s2388_s24 = sphi %s2436_s24, %s17_s24  }
   0x2   : > { %p247_p1 = scmp.lt.s32.totalorder %s2388_s24, 3 }
   0x4   : > { %p248_p2 = pnand %p2073_p0, %p247_p1 }
   0x5   : > { %p283_p3 = scmp.lt.s32.totalorder (!%p248_p2), %s2069_s25, 1  ;;  %s2390_s20 = smov (!%p248_p2), 96  }
   0x6   : > { %251 = sbr.rel (%p248_p2) target bundleno = 1957 (0x7a5), region = 48  ;;  %s2391_s21 = smov (!%p248_p2), 32  }
   0x7   : > { %s2393_s15 = smov (!%p248_p2), 16   ;;  %s2395_s16 = smov (!%p248_p2), 64  }
   0xb   : > { %s3273_s25 = smov (!%p283_p3, %s2069_s25), 1  ;;  %v2367_v16 = vld [vmem:[%s3266_s2 + $0x8] sm:$0xff]   ;;  %v2368_v17 = vld [vmem:[%s3266_s2] sm:$0xff]   ;;  %vm549_vm0 = vcmask 261120  }
   0xc   : > { %s2132_s26 = sshll.u32 %s3273_s25, 6  ;;  %2233 = vmatprep.subr.bf16.mxu1 %v2367_v16  ;;  %v2369_v43 = vld [vmem:[%s3267_s3 + $0x8] sm:$0xff]   ;;  %v2370_v44 = vld [vmem:[%s3267_s3] sm:$0xff]   ;;  %s2078_s19 = sshll.u32 %s3273_s25, 3 }
   0xd   : > { %s292_s29 = scalar_lea.vmem %s3265_s1, %s2132_s26  ;;  %s2453_s9 = scalar_lea.vmem %s3264_s0, %s2132_s26  ;;  %2234 = vmatpush3.bf16.msra.mxu1 %v2367_v16 }
   0xe   : > { %v2351_v0 = vld [vmem:[%s292_s29 + $0x38] sm:$0xff]   ;;  %v2352_v1 = vld [vmem:[%s292_s29 + $0x30] sm:$0xff]   ;;  %v2353_v2 = vld [vmem:[%s292_s29 + $0x28] sm:$0xff]   ;;  %2235 = vmatprep.subr.bf16.mxu1 %v2368_v17  ;;  %s296_s23 = scalar_lea.vmem %s3271_s7, %s2078_s19 }
   0xf   : > { %2201 = vmatprep.subr.bf16.mxu0 %v2351_v0  ;;  %v2354_v3 = vld [vmem:[%s292_s29 + $0x20] sm:$0xff]   ;;  %v2355_v5 = vld [vmem:[%s292_s29 + $0x18] sm:$0xff]   ;;  %v2356_v6 = vld [vmem:[%s292_s29 + $0x10] sm:$0xff]  }
  0x10   : > { %2202 = vmatpush3.bf16.msra.mxu0 %v2351_v0  ;;  %v2359_v4 = vld [vmem:[%s2453_s9] sm:$0xff]   ;;  %v2357_v7 = vld [vmem:[%s292_s29 + $0x8] sm:$0xff]   ;;  %v2460_v10 = vld [vmem:[%s2453_s9 + $0x10] sm:$0xff]  }
  0x11   : > { %2203 = vmatprep.subr.bf16.mxu0 %v2352_v1  ;;  %2217 = vmatprep.mubr.bf16.mxu0 %v2359_v4  ;;  %v2358_v8 = vld [vmem:[%s292_s29] sm:$0xff]   ;;  %v2457_v9 = vld [vmem:[%s2453_s9 + $0x8] sm:$0xff]   ;;  %v2465_v11 = vld [vmem:[%s2453_s9 + $0x18] sm:$0xff]  }
  0x12   : > { %v2468_v12 = vld [vmem:[%s2453_s9 + $0x20] sm:$0xff]   ;;  %v2473_v13 = vld [vmem:[%s2453_s9 + $0x28] sm:$0xff]   ;;  %v2476_v14 = vld [vmem:[%s2453_s9 + $0x30] sm:$0xff]   ;;  %2236 = vmatpush3.bf16.msra.mxu1 %v2368_v17 }
  0x13   : > { %v2481_v15 = vld [vmem:[%s2453_s9 + $0x38] sm:$0xff]   ;;  %2253 = vmatprep.subr.bf16.mxu1 %v2369_v43 }
  0x14   : > { %2204 = vmatpush3.bf16.msra.mxu0 %v2352_v1 }
  0x15   : > { %2205 = vmatprep.subr.bf16.mxu0 %v2353_v2 }
  0x18   : > { %2206 = vmatpush3.bf16.msra.mxu0 %v2353_v2 }
  0x19   : > { %2207 = vmatprep.subr.bf16.mxu0 %v2354_v3 }
  0x1c   : > { %2208 = vmatpush3.bf16.msra.mxu0 %v2354_v3 }
  0x1d   : > { %2209 = vmatprep.subr.bf16.mxu0 %v2355_v5 }
  0x20   : > { %2210 = vmatpush3.bf16.msra.mxu0 %v2355_v5 }
  0x21   : > { %2211 = vmatprep.subr.bf16.mxu0 %v2356_v6 }
  0x24   : > { %2212 = vmatpush3.bf16.msra.mxu0 %v2356_v6 }
  0x25   : > { %2213 = vmatprep.subr.bf16.mxu0 %v2357_v7 }
  0x28   : > { %2214 = vmatpush3.bf16.msra.mxu0 %v2357_v7 }
  0x29   : > { %2215 = vmatprep.subr.bf16.mxu0 %v2358_v8 }
  0x2c   : > { %2216 = vmatpush3.bf16.msra.mxu0 %v2358_v8 }
  0x2f   : > { %2218 = vmatmul.mubr.bf16.vlgmr.msra.gmra.mxu0 %v2457_v9 }
  0x30   : > { %2221 = vmatprep.mubr.bf16.mxu0 %v2460_v10 }
  0x37   : > { %2222 = vmatmul.mubr.bf16.gmra.mxu0 %v2465_v11 }
  0x38   : > { %2225 = vmatprep.mubr.bf16.mxu0 %v2468_v12 }
  0x3f   : > { %2226 = vmatmul.mubr.bf16.gmra.mxu0 %v2473_v13 }
  0x40   : > { %2229 = vmatprep.mubr.bf16.mxu0 %v2476_v14 }
  0x47   : > { %2230 = vmatmul.mubr.bf16.gmra.mxu0 %v2481_v15 }
  0x48   : > { %2289 = vmatprep.mubr.bf16.mxu0 %v2359_v4 }
  0xef   : > { %v2219_v18 = vpop.f32.mrf.mxu0 }
  0xf1   : > { %v462_v19 = vpop.f32.mrf.mxu0 }
  0xf3   : > { %v2220_v20 = vpop.f32.mrf.mxu0 }
  0xf4   : > { %v526_v23 = vpack.c.bf16 %v2220_v20, %v2219_v18 }
  0xf5   : > { %v465_v21 = vpop.f32.mrf.mxu0 }
  0xf6   : > { %v525_v22 = vpack.c.bf16 %v465_v21, %v462_v19 }
  0xf7   : > { %v2223_v24 = vpop.f32.mrf.mxu0 }
  0xf8   : > { %2237 = vmatprep.mubr.msk.bf16.mxu1 %vm549_vm0, %v525_v22 }
  0xf9   : > { %v478_v25 = vpop.f32.mrf.mxu0  ;;  %2238 = vmatmul.mubr.msk.bf16.vlgmr.msra.gmra.mxu1 %vm549_vm0, %v526_v23 }
  0xfa   : > { %2254 = vmatpush3.bf16.msra.mxu1 %v2369_v43  ;;  %v2555_v43 = vld [vmem:[%s3270_s6] sm:$0xff] }
  0xfb   : > { %v2224_v26 = vpop.f32.mrf.mxu0  ;;  %2255 = vmatprep.subr.bf16.mxu1 %v2370_v44 }
  0xfc   : > { %v528_v29 = vpack.c.bf16 %v2224_v26, %v2223_v24 }
  0xfd   : > { %v481_v27 = vpop.f32.mrf.mxu0 }
  0xfe   : > { %v527_v28 = vpack.c.bf16 %v481_v27, %v478_v25  ;;  %2256 = vmatpush3.bf16.msra.mxu1 %v2370_v44 }
  0xff   : > { %v2227_v30 = vpop.f32.mrf.mxu0 }
 0x100   : > { %2241 = vmatprep.mubr.msk.bf16.mxu1 %vm549_vm0, %v527_v28 }
 0x101   : > { %v494_v31 = vpop.f32.mrf.mxu0  ;;  %2242 = vmatmul.mubr.msk.bf16.gmra.mxu1 %vm549_vm0, %v528_v29 }
 0x103   : > { %v2228_v32 = vpop.f32.mrf.mxu0 }
 0x104   : > { %v530_v35 = vpack.c.bf16 %v2228_v32, %v2227_v30 }
 0x105   : > { %v497_v33 = vpop.f32.mrf.mxu0 }
 0x106   : > { %v529_v34 = vpack.c.bf16 %v497_v33, %v494_v31 }
 0x107   : > { %v2231_v36 = vpop.f32.mrf.mxu0 }
 0x108   : > { %2245 = vmatprep.mubr.msk.bf16.mxu1 %vm549_vm0, %v529_v34 }
 0x109   : > { %v510_v37 = vpop.f32.mrf.mxu0  ;;  %2246 = vmatmul.mubr.msk.bf16.gmra.mxu1 %vm549_vm0, %v530_v35 }
 0x10b   : > { %v2232_v38 = vpop.f32.mrf.mxu0 }
 0x10c   : > { %v532_v41 = vpack.c.bf16 %v2232_v38, %v2231_v36 }
 0x10d   : > { %v513_v39 = vpop.f32.mrf.mxu0 }
 0x10e   : > { %v531_v40 = vpack.c.bf16 %v513_v39, %v510_v37  ;;  %v711_v37 = vlaneseq }
 0x110   : > { %2249 = vmatprep.mubr.msk.bf16.mxu1 %vm549_vm0, %v531_v40  ;;  %v2550_v40 = vshrl.u32 %v711_v37, 7 }
 0x111   : > { %2250 = vmatmul.mubr.msk.bf16.gmra.mxu1 %vm549_vm0, %v532_v41 }
 0x1b9   : > { %v2498_v42 = vpop.f32.mrf.mxu1 }
 0x1ba   : > { %v674_v52 = vsel %vm549_vm0, %v2498_v42, 0.0 }
 0x1bb   : > { %v2506_v45 = vpop.f32.mrf.mxu1 }
 0x1bc   : > { %v671_v48 = vsel %vm549_vm0, %v2506_v45, 0.0 }
 0x1bd   : > { %v2508_v46 = vpop.f32.mrf.mxu1 }
 0x1be   : > { %v676_v55 = vsel %vm549_vm0, %v2508_v46, 0.0 }
 0x1bf   : > { %v611_v47 = vpop.f32.mrf.mxu1 }
 0x1c0   : > { %v672_v49 = vsel %vm549_vm0, %v611_v47, 0.0 }
 0x1c1   : > { %v673_v50 = vadd.f32 %v672_v49, %v671_v48  ;;  %v2513_v51 = vpop.f32.mrf.mxu1  ;;  %v713_v48 = vsub.s32 0, %v2550_v40 }
 0x1c2   : > { %v682_v0 = vsel %vm549_vm0, %v2513_v51, 0.0 }
 0x1c3   : > { %v675_v53 = vadd.f32 %v674_v52, %v673_v50  ;;  %v624_v54 = vpop.f32.mrf.mxu1 }
 0x1c4   : > { %v678_v58 = vsel %vm549_vm0, %v624_v54, 0.0 }
 0x1c5   : > { %v677_v56 = vadd.f32 %v676_v55, %v675_v53  ;;  %v2519_v57 = vpop.f32.mrf.mxu1 }
 0x1c6   : > { %v684_v3 = vsel %vm549_vm0, %v2519_v57, 0.0 }
 0x1c7   : > { %v679_v59 = vadd.f32 %v678_v58, %v677_v56  ;;  %v627_v60 = vpop.f32.mrf.mxu1 }
 0x1c8   : > { %v680_v61 = vsel %vm549_vm0, %v627_v60, 0.0 }
 0x1c9   : > { %v681_v62 = vadd.f32 %v680_v61, %v679_v59  ;;  %v2523_v63 = vpop.f32.mrf.mxu1 }
 0x1ca   : > { %v690_v19 = vsel %vm549_vm0, %v2523_v63, 0.0 }
 0x1cb   : > { %v683_v1 = vadd.f32 %v682_v0, %v681_v62  ;;  %v640_v2 = vpop.f32.mrf.mxu1 }
 0x1cc   : > { %v686_v6 = vsel %vm549_vm0, %v640_v2, 0.0 }
 0x1cd   : > { %v685_v4 = vadd.f32 %v684_v3, %v683_v1  ;;  %v2529_v5 = vpop.f32.mrf.mxu1 }
 0x1ce   : > { %v692_v22 = vsel %vm549_vm0, %v2529_v5, 0.0 }
 0x1cf   : > { %v687_v7 = vadd.f32 %v686_v6, %v685_v4  ;;  %v643_v8 = vpop.f32.mrf.mxu1 }
 0x1d0   : > { %v688_v16 = vsel %vm549_vm0, %v643_v8, 0.0 }
 0x1d1   : > { %v689_v17 = vadd.f32 %v688_v16, %v687_v7  ;;  %v2533_v18 = vpop.f32.mrf.mxu1 }
 0x1d2   : > { %v698_v30 = vsel %vm549_vm0, %v2533_v18, 0.0 }
 0x1d3   : > { %v691_v20 = vadd.f32 %v690_v19, %v689_v17  ;;  %v2537_v21 = vpop.f32.mrf.mxu1 }
 0x1d4   : > { %v694_v25 = vsel %vm549_vm0, %v2537_v21, 0.0 }
 0x1d5   : > { %v693_v23 = vadd.f32 %v692_v22, %v691_v20  ;;  %v2541_v24 = vpop.f32.mrf.mxu1 }
 0x1d6   : > { %v700_v32 = vsel %vm549_vm0, %v2541_v24, 0.0 }
 0x1d7   : > { %v695_v26 = vadd.f32 %v694_v25, %v693_v23  ;;  %v659_v27 = vpop.f32.mrf.mxu1 }
 0x1d8   : > { %v696_v28 = vsel %vm549_vm0, %v659_v27, 0.0 }
 0x1d9   : > { %v697_v29 = vadd.f32 %v696_v28, %v695_v26 }
 0x1db   : > { %v699_v31 = vadd.f32 %v698_v30, %v697_v29 }
 0x1dd   : > { %v701_v33 = vadd.f32 %v700_v32, %v699_v31 }
 0x1df   : > { %v702_v34 = vrot.slane %v701_v33, 4 }
 0x1e1   : > { %v703_v35 = vadd.f32 %v702_v34, %v701_v33 }
 0x1e3   : > { %v704_v36 = vrot.slane %v703_v35, 2 }
 0x1e5   : > { %v705_v38 = vadd.f32 %v704_v36, %v703_v35 }
 0x1e7   : > { %v706_v39 = vrot.slane %v705_v38, 1 }
 0x1e9   : > { %v707_v41 = vadd.f32 %v706_v39, %v705_v38 }
 0x1eb   : > { %v709_v44 = vmul.f32 0.0078125, %v707_v41 }
 0x1ed   : > { %v710_v49 = vmul.f32 %v709_v44, %v2555_v43 }
 0x1ef   : > { %v714_v50 = vrot.slane %v710_v49, %v713_v48 }
 0x1f1   : > { %v2562_v52 = vsub.f32 %v2506_v45, %v714_v50  ;;  %v2564_v53 = vsub.f32 %v611_v47, %v714_v50  ;;  %v2567_v55 = vsub.f32 %v2498_v42, %v714_v50  ;;  %v2570_v56 = vsub.f32 %v2508_v46, %v714_v50 }
 0x1f2   : > { %v2576_v61 = vsub.f32 %v624_v54, %v714_v50  ;;  %v2580_v62 = vsub.f32 %v627_v60, %v714_v50  ;;  %v2587_v1 = vsub.f32 %v2513_v51, %v714_v50  ;;  %v2593_v60 = vsub.f32 %v2519_v57, %v714_v50 }
 0x1f3   : > { %v731_v58 = vmul.f32 %v2562_v52, %v2562_v52  ;;  %v732_v59 = vmul.f32 %v2564_v53, %v2564_v53  ;;  %v733_v45 = vmul.f32 %v2567_v55, %v2567_v55  ;;  %v734_v42 = vmul.f32 %v2570_v56, %v2570_v56 }
 0x1f4   : > { %v735_v54 = vmul.f32 %v2576_v61, %v2576_v61  ;;  %v736_v6 = vmul.f32 %v2580_v62, %v2580_v62  ;;  %v2598_v17 = vsub.f32 %v640_v2, %v714_v50  ;;  %v737_v51 = vmul.f32 %v2587_v1, %v2587_v1 }
 0x1f5   : > { %v747_v47 = vsel %vm549_vm0, %v731_v58, 0.0  ;;  %v748_v46 = vsel %vm549_vm0, %v732_v59, 0.0  ;;  %v750_v3 = vsel %vm549_vm0, %v733_v45, 0.0  ;;  %v752_v7 = vsel %vm549_vm0, %v734_v42, 0.0 }
 0x1f6   : > { %v749_v0 = vadd.f32 %v748_v46, %v747_v47  ;;  %v754_v19 = vsel %vm549_vm0, %v735_v54, 0.0  ;;  %v2603_v22 = vsub.f32 %v643_v8, %v714_v50  ;;  %v738_v57 = vmul.f32 %v2593_v60, %v2593_v60 }
 0x1f7   : > { %v756_v23 = vsel %vm549_vm0, %v736_v6, 0.0  ;;  %v2609_v26 = vsub.f32 %v2523_v63, %v714_v50  ;;  %v739_v2 = vmul.f32 %v2598_v17, %v2598_v17  ;;  %v758_v28 = vsel %vm549_vm0, %v737_v51, 0.0 }
 0x1f8   : > { %v751_v4 = vadd.f32 %v750_v3, %v749_v0  ;;  %v2615_v30 = vsub.f32 %v2529_v5, %v714_v50  ;;  %v740_v8 = vmul.f32 %v2603_v22, %v2603_v22  ;;  %v760_v31 = vsel %vm549_vm0, %v738_v57, 0.0 }
 0x1f9   : > { %v727_v33 = vsub.f32 %v2537_v21, %v714_v50  ;;  %v741_v63 = vmul.f32 %v2609_v26, %v2609_v26  ;;  %v762_v34 = vsel %vm549_vm0, %v739_v2, 0.0  ;;  %v728_v36 = vsub.f32 %v659_v27, %v714_v50 }
 0x1fa   : > { %v753_v16 = vadd.f32 %v752_v7, %v751_v4  ;;  %v742_v37 = vmul.f32 %v2615_v30, %v2615_v30  ;;  %v764_v5 = vsel %vm549_vm0, %v740_v8, 0.0  ;;  %v2628_v39 = vsub.f32 %v2533_v18, %v714_v50 }
 0x1fb   : > { %v743_v41 = vmul.f32 %v727_v33, %v727_v33  ;;  %v766_v44 = vsel %vm549_vm0, %v741_v63, 0.0  ;;  %v2632_v49 = vsub.f32 %v2541_v24, %v714_v50  ;;  %v744_v58 = vmul.f32 %v728_v36, %v728_v36 }
 0x1fc   : > { %v755_v20 = vadd.f32 %v754_v19, %v753_v16  ;;  %v768_v59 = vsel %vm549_vm0, %v742_v37, 0.0  ;;  %v745_v45 = vmul.f32 %v2628_v39, %v2628_v39 }
 0x1fd   : > { %v770_v42 = vsel %vm549_vm0, %v743_v41, 0.0  ;;  %v746_v18 = vmul.f32 %v2632_v49, %v2632_v49  ;;  %v772_v46 = vsel %vm549_vm0, %v744_v58, 0.0 }
 0x1fe   : > { %v757_v25 = vadd.f32 %v756_v23, %v755_v20  ;;  %v774_v54 = vsel %vm549_vm0, %v745_v45, 0.0  ;;  %v787_v23 = vsub.s32 1, %v2550_v40 }
 0x1ff   : > { %v776_v50 = vsel %vm549_vm0, %v746_v18, 0.0 }
 0x200   : > { %v759_v29 = vadd.f32 %v758_v28, %v757_v25  ;;  %v825_v25 = vsub.s32 2, %v2550_v40  ;;  %v2646_v2 = vrot.slane %v2555_v43, %v787_v23 }
 0x202   : > { %v761_v32 = vadd.f32 %v760_v31, %v759_v29  ;;  %v2649_v28 = vrot.slane %v2555_v43, %v825_v25  ;;  %v2652_v29 = vmul.f32 %v2646_v2, %v727_v33  ;;  %v802_v8 = vmul.f32 %v2646_v2, %v728_v36 }
 0x203   : > { %v789_v31 = vmul.f32 %v2646_v2, %v2562_v52  ;;  %v791_v63 = vmul.f32 %v2646_v2, %v2567_v55  ;;  %v794_v33 = vmul.f32 %v2646_v2, %v2580_v62  ;;  %v795_v52 = vmul.f32 %v2646_v2, %v2587_v1 }
 0x204   : > { %v763_v35 = vadd.f32 %v762_v34, %v761_v32  ;;  %v790_v32 = vmul.f32 %v2646_v2, %v2564_v53  ;;  %v792_v34 = vmul.f32 %v2646_v2, %v2570_v56  ;;  %v796_v53 = vmul.f32 %v2646_v2, %v2593_v60 }
 0x205   : > { %v797_v55 = vmul.f32 %v2646_v2, %v2598_v17  ;;  %v798_v56 = vmul.f32 %v2646_v2, %v2603_v22  ;;  %v800_v17 = vmul.f32 %v2646_v2, %v2615_v30 }
 0x206   : > { %v765_v38 = vadd.f32 %v764_v5, %v763_v35  ;;  %v793_v35 = vmul.f32 %v2646_v2, %v2576_v61  ;;  %v799_v5 = vmul.f32 %v2646_v2, %v2609_v26 }
 0x208   : > { %v767_v21 = vadd.f32 %v766_v44, %v765_v38 }
 0x20a   : > { %v769_v27 = vadd.f32 %v768_v59, %v767_v21 }
 0x20c   : > { %v771_v47 = vadd.f32 %v770_v42, %v769_v27 }
 0x20e   : > { %v773_v0 = vadd.f32 %v772_v46, %v771_v47 }
 0x210   : > { %v775_v24 = vadd.f32 %v774_v54, %v773_v0 }
 0x212   : > { %v777_v3 = vadd.f32 %v776_v50, %v775_v24 }
 0x214   : > { %v778_v4 = vrot.slane %v777_v3, 4 }
 0x216   : > { %v779_v6 = vadd.f32 %v778_v4, %v777_v3 }
 0x218   : > { %v780_v7 = vrot.slane %v779_v6, 2 }
 0x21a   : > { %v781_v16 = vadd.f32 %v780_v7, %v779_v6 }
 0x21c   : > { %v782_v51 = vrot.slane %v781_v16, 1 }
 0x21e   : > { %v783_v19 = vadd.f32 %v782_v51, %v781_v16 }
 0x220   : > { %v784_v20 = vmul.f32 0.0078125, %v783_v19 }
 0x222   : > { %v805_v57 = vadd.f32 1e-05, %v784_v20 }
 0x224   : > { %2377 = vrsqrt.f32 %v805_v57 }
 0x231   : > { %v2667_v37 = vpop.eup %2377 }
 0x232   : > { %v807_v36 = vmul.f32 %v2667_v37, %v789_v31  ;;  %v808_v61 = vmul.f32 %v2667_v37, %v790_v32  ;;  %v809_v62 = vmul.f32 %v2667_v37, %v791_v63  ;;  %v810_v1 = vmul.f32 %v2667_v37, %v792_v34 }
 0x233   : > { %v811_v38 = vmul.f32 %v2667_v37, %v793_v35  ;;  %v812_v60 = vmul.f32 %v2667_v37, %v794_v33  ;;  %v820_v22 = vmul.f32 %v2667_v37, %v802_v8  ;;  %v813_v27 = vmul.f32 %v2667_v37, %v795_v52 }
 0x234   : > { %v827_v41 = vadd.f32 %v2649_v28, %v807_v36  ;;  %v828_v44 = vadd.f32 %v2649_v28, %v808_v61  ;;  %v829_v21 = vadd.f32 %v2649_v28, %v809_v62  ;;  %v830_v58 = vadd.f32 %v2649_v28, %v810_v1 }
 0x235   : > { %v831_v26 = vadd.f32 %v2649_v28, %v811_v38  ;;  %v832_v59 = vadd.f32 %v2649_v28, %v812_v60  ;;  %v814_v30 = vmul.f32 %v2667_v37, %v796_v53  ;;  %v833_v6 = vadd.f32 %v2649_v28, %v813_v27 }
 0x236   : > { %vm843_vm1 = vcmp.gt.f32.partialorder %v827_v41, 0.0  ;;  %vm844_vm2 = vcmp.gt.f32.partialorder %v828_v44, 0.0  ;;  %v859_v45 = vmul.f32 0.01, %v827_v41  ;;  %v860_v42 = vmul.f32 0.01, %v828_v44 }
 0x237   : > { %vm845_vm3 = vcmp.gt.f32.partialorder %v829_v21, 0.0  ;;  %vm846_vm4 = vcmp.gt.f32.partialorder %v830_v58, 0.0  ;;  %v861_v47 = vmul.f32 0.01, %v829_v21  ;;  %v862_v46 = vmul.f32 0.01, %v830_v58 }
 0x238   : > { %v2696_v18 = vsel %vm843_vm1, %v827_v41, %v859_v45  ;;  %vm847_vm5 = vcmp.gt.f32.partialorder %v831_v26, 0.0  ;;  %vm848_vm6 = vcmp.gt.f32.partialorder %v832_v59, 0.0  ;;  %v2698_v0 = vsel %vm844_vm2, %v828_v44, %v860_v42 }
 0x239   : > { %v2700_v54 = vsel %vm845_vm3, %v829_v21, %v861_v47  ;;  %v863_v24 = vmul.f32 0.01, %v831_v26  ;;  %v864_v50 = vmul.f32 0.01, %v832_v59  ;;  %v891_v3 = vpack.c.bf16 %v2698_v0, %v2696_v18 }
 0x23a   : > { %v2704_v4 = vsel %vm846_vm4, %v830_v58, %v862_v46  ;;  %v834_v7 = vadd.f32 %v2649_v28, %v814_v30  ;;  %v815_v20 = vmul.f32 %v2667_v37, %v797_v55  ;;  %vm849_vm7 = vcmp.gt.f32.partialorder %v833_v6, 0.0 }
 0x23b   : > { %v892_v16 = vpack.c.bf16 %v2704_v4, %v2700_v54  ;;  %v2710_v51 = vsel %vm847_vm5, %v831_v26, %v863_v24  ;;  %v2712_v19 = vsel %vm848_vm6, %v832_v59, %v864_v50  ;;  %2257 = vmatprep.mubr.msk.bf16.mxu1 %vm549_vm0, %v891_v3  ;;  %v865_v23 = vmul.f32 0.01, %v833_v6 }
 0x23c   : > { %v893_v57 = vpack.c.bf16 %v2712_v19, %v2710_v51  ;;  %vm850_vm8 = vcmp.gt.f32.partialorder %v834_v7, 0.0  ;;  %v866_v25 = vmul.f32 0.01, %v834_v7  ;;  %v816_v8 = vmul.f32 %v2667_v37, %v798_v56 }
 0x23d   : > { %2258 = vmatmul.mubr.msk.bf16.vlgmr.msra.gmra.mxu1 %vm549_vm0, %v892_v16  ;;  %v835_v31 = vadd.f32 %v2649_v28, %v815_v20  ;;  %v817_v32 = vmul.f32 %v2667_v37, %v799_v5  ;;  %v818_v63 = vmul.f32 %v2667_v37, %v800_v17  ;;  %v819_v34 = vmul.f32 %v2667_v37, %v2652_v29 }
 0x23e   : > { %2261 = vmatprep.mubr.msk.bf16.mxu1 %vm549_vm0, %v893_v57  ;;  %v840_v35 = vadd.f32 %v2649_v28, %v820_v22  ;;  %v836_v33 = vadd.f32 %v2649_v28, %v816_v8  ;;  %v2728_v53 = vsel %vm849_vm7, %v833_v6, %v865_v23  ;;  %v2730_v55 = vsel %vm850_vm8, %v834_v7, %v866_v25 }
 0x23f   : > { %vm851_vm9 = vcmp.gt.f32.partialorder %v835_v31, 0.0  ;;  %v867_v52 = vmul.f32 0.01, %v835_v31  ;;  %v837_v56 = vadd.f32 %v2649_v28, %v817_v32  ;;  %v838_v36 = vadd.f32 %v2649_v28, %v818_v63 }
 0x240   : > { %vm852_vm10 = vcmp.gt.f32.partialorder %v836_v33, 0.0  ;;  %v868_v61 = vmul.f32 0.01, %v836_v33  ;;  %v839_v29 = vadd.f32 %v2649_v28, %v819_v34  ;;  %v803_v5 = vmul.f32 %v2646_v2, %v2628_v39 }
 0x241   : > { %v2734_v62 = vsel %vm851_vm9, %v835_v31, %v867_v52  ;;  %v804_v1 = vmul.f32 %v2646_v2, %v2632_v49  ;;  %v894_v38 = vpack.c.bf16 %v2730_v55, %v2728_v53  ;;  %v869_v17 = vmul.f32 0.01, %v837_v56 }
 0x242   : > { %v2743_v60 = vsel %vm852_vm10, %v836_v33, %v868_v61  ;;  %v870_v41 = vmul.f32 0.01, %v838_v36  ;;  %v821_v44 = vmul.f32 %v2667_v37, %v803_v5  ;;  %v872_v58 = vmul.f32 0.01, %v840_v35 }
 0x243   : > { %v895_v22 = vpack.c.bf16 %v2743_v60, %v2734_v62  ;;  %v822_v21 = vmul.f32 %v2667_v37, %v804_v1  ;;  %vm853_vm11 = vcmp.gt.f32.partialorder %v837_v56, 0.0  ;;  %vm854_vm12 = vcmp.gt.f32.partialorder %v838_v36, 0.0 }
 0x244   : > { %v871_v39 = vmul.f32 0.01, %v839_v29  ;;  %vm855_vm13 = vcmp.gt.f32.partialorder %v839_v29, 0.0  ;;  %vm856_vm14 = vcmp.gt.f32.partialorder %v840_v35, 0.0  ;;  %v2751_v49 = vsel %vm853_vm11, %v837_v56, %v869_v17 }
 0x245   : > { %2262 = vmatmul.mubr.msk.bf16.gmra.mxu1 %vm549_vm0, %v894_v38  ;;  %v2753_v2 = vsel %vm854_vm12, %v838_v36, %v870_v41  ;;  %v841_v26 = vadd.f32 %v2649_v28, %v821_v44  ;;  %v842_v59 = vadd.f32 %v2649_v28, %v822_v21  ;;  %v2759_v37 = vsel %vm856_vm14, %v840_v35, %v872_v58 }
 0x246   : > { %2265 = vmatprep.mubr.msk.bf16.mxu1 %vm549_vm0, %v895_v22  ;;  %v2757_v27 = vsel %vm855_vm13, %v839_v29, %v871_v39  ;;  %v896_v45 = vpack.c.bf16 %v2753_v2, %v2751_v49  ;;  %v1038_v34 = vsub.s32 6, %v2550_v40 }
 0x247   : > { %v897_v30 = vpack.c.bf16 %v2759_v37, %v2757_v27  ;;  %v873_v42 = vmul.f32 0.01, %v841_v26  ;;  %v874_v47 = vmul.f32 0.01, %v842_v59  ;;  %vm857_vm15 = vcmp.gt.f32.partialorder %v841_v26, 0.0 }
 0x248   : > { %vm858_vm1 = vcmp.gt.f32.partialorder %v842_v59, 0.0  ;;  %v2788_v56 = vrot.slane %v2555_v43, %v1038_v34 }
 0x249   : > { %v2767_v46 = vsel %vm857_vm15, %v841_v26, %v873_v42  ;;  %v2769_v28 = vsel %vm858_vm1, %v842_v59, %v874_v47 }
 0x24a   : > { %v898_v24 = vpack.c.bf16 %v2769_v28, %v2767_v46 }
 0x24d   : > { %2266 = vmatmul.mubr.msk.bf16.gmra.mxu1 %vm549_vm0, %v896_v45 }
 0x24e   : > { %2269 = vmatprep.mubr.msk.bf16.mxu1 %vm549_vm0, %v897_v30 }
 0x255   : > { %2270 = vmatmul.mubr.msk.bf16.gmra.mxu1 %vm549_vm0, %v898_v24 }
 0x2fd   : > { %v2259_v50 = vpop.f32.mrf.mxu1 }
 0x2fe   : > { %v1042_v59 = vadd.f32 %v2259_v50, %v2788_v56 }
 0x2ff   : > { %v973_v3 = vpop.f32.mrf.mxu1 }
 0x300   : > { %v1040_v21 = vadd.f32 %v2788_v56, %v973_v3  ;;  %vm1058_vm6 = vcmp.gt.f32.partialorder %v1042_v59, 0.0 }
 0x301   : > { %v2260_v6 = vpop.f32.mrf.mxu1 }
 0x302   : > { %v1043_v22 = vadd.f32 %v2260_v6, %v2788_v56  ;;  %v1224_v45 = vpack.c.bf16 %v2260_v6, %v2259_v50  ;;  %v1072_v24 = vmul.f32 0.01, %v1040_v21  ;;  %vm1056_vm5 = vcmp.gt.f32.partialorder %v1040_v21, 0.0 }
 0x303   : > { %v976_v7 = vpop.f32.mrf.mxu1 }
 0x304   : > { %v1041_v5 = vadd.f32 %v2788_v56, %v976_v7  ;;  %v1223_v38 = vpack.c.bf16 %v976_v7, %v973_v3  ;;  %v1075_v26 = vmul.f32 0.01, %v1043_v22  ;;  %vm1059_vm3 = vcmp.gt.f32.partialorder %v1043_v22, 0.0 }
 0x305   : > { %v2263_v16 = vpop.f32.mrf.mxu1  ;;  %v1074_v7 = vmul.f32 0.01, %v1042_v59  ;;  %v1088_v34 = vsel %vm1056_vm5, %v1040_v21, %v1072_v24 }
 0x306   : > { %v1073_v41 = vmul.f32 0.01, %v1041_v5  ;;  %vm1057_vm2 = vcmp.gt.f32.partialorder %v1041_v5, 0.0  ;;  %v1091_v42 = vsel %vm1059_vm3, %v1043_v22, %v1075_v26  ;;  %v1046_v6 = vadd.f32 %v2263_v16, %v2788_v56 }
 0x307   : > { %v989_v20 = vpop.f32.mrf.mxu1 }
 0x308   : > { %v1089_v39 = vsel %vm1057_vm2, %v1041_v5, %v1073_v41  ;;  %v1044_v3 = vadd.f32 %v2788_v56, %v989_v20  ;;  %vm1062_vm10 = vcmp.gt.f32.partialorder %v1046_v6, 0.0  ;;  %v1078_v5 = vmul.f32 0.01, %v1046_v6 }
 0x309   : > { %v2264_v57 = vpop.f32.mrf.mxu1 }
 0x30a   : > { %v1226_v44 = vpack.c.bf16 %v2264_v57, %v2263_v16  ;;  %v1047_v30 = vadd.f32 %v2264_v57, %v2788_v56  ;;  %v1090_v57 = vsel %vm1058_vm6, %v1042_v59, %v1074_v7  ;;  %vm1060_vm8 = vcmp.gt.f32.partialorder %v1044_v3, 0.0 }
 0x30b   : > { %v992_v23 = vpop.f32.mrf.mxu1  ;;  %v1094_v41 = vsel %vm1062_vm10, %v1046_v6, %v1078_v5 }
 0x30c   : > { %v1225_v61 = vpack.c.bf16 %v992_v23, %v989_v20  ;;  %v1045_v58 = vadd.f32 %v2788_v56, %v992_v23  ;;  %v1079_v50 = vmul.f32 0.01, %v1047_v30  ;;  %vm1063_vm7 = vcmp.gt.f32.partialorder %v1047_v30, 0.0 }
 0x30d   : > { %v2774_v25 = vpop.f32.mrf.mxu1 }
 0x30e   : > { %v1077_v47 = vmul.f32 0.01, %v1045_v58  ;;  %vm1061_vm4 = vcmp.gt.f32.partialorder %v1045_v58, 0.0 }
 0x30f   : > { %v2776_v8 = vpop.f32.mrf.mxu1 }
 0x311   : > { %v2268_v31 = vpop.f32.mrf.mxu1 }
 0x312   : > { %v1228_v32 = vpack.c.bf16 %v2268_v31, %v2774_v25 }
 0x313   : > { %v1008_v63 = vpop.f32.mrf.mxu1 }
 0x314   : > { %1249 = vrot.lane.b32.xlu1 %v1228_v32, %s2390_s20  ;;  %v1227_v33 = vpack.c.bf16 %v1008_v63, %v2776_v8  ;;  %v1049_v23 = vadd.f32 %v2788_v56, %v1008_v63  ;;  %v1093_v32 = vsel %vm1061_vm4, %v1045_v58, %v1077_v47 }
 0x315   : > { %v2781_v35 = vpop.f32.mrf.mxu1 }
 0x316   : > { %v1081_v20 = vmul.f32 0.01, %v1049_v23  ;;  %vm1065_vm9 = vcmp.gt.f32.partialorder %v1049_v23, 0.0 }
 0x317   : > { %v2784_v52 = vpop.f32.mrf.mxu1 }
 0x318   : > { %1247 = vrot.lane.b32.xlu1 %v1227_v33, %s2390_s20  ;;  %v1076_v33 = vmul.f32 0.01, %v1044_v3 }
 0x319   : > { %v2790_v36 = vpop.f32.mrf.mxu1 }
 0x31a   : > { %v1230_v29 = vpack.c.bf16 %v2790_v36, %v2781_v35  ;;  %v1092_v63 = vsel %vm1060_vm8, %v1044_v3, %v1076_v33 }
 0x31b   : > { %v1024_v1 = vpop.f32.mrf.mxu1 }
 0x31c   : > { %1243 = vrot.lane.b32.xlu1 %v1225_v61, %s2390_s20  ;;  %1253 = vrot.lane.b32.xlu0 %v1230_v29, %s2390_s20  ;;  %v1229_v17 = vpack.c.bf16 %v1024_v1, %v2784_v52  ;;  %v1051_v61 = vadd.f32 %v2268_v31, %v2788_v56  ;;  %v1095_v29 = vsel %vm1063_vm7, %v1047_v30, %v1079_v50 }
 0x31d   : > { %v1053_v16 = vadd.f32 %v2788_v56, %v1024_v1  ;;  %v1050_v31 = vadd.f32 %v2774_v25, %v2788_v56  ;;  %v1052_v1 = vadd.f32 %v2788_v56, %v2784_v52 }
 0x31e   : > { %v1083_v22 = vmul.f32 0.01, %v1051_v61  ;;  %vm1067_vm11 = vcmp.gt.f32.partialorder %v1051_v61, 0.0 }
 0x31f   : > { %vm1069_vm13 = vcmp.gt.f32.partialorder %v1053_v16, 0.0  ;;  %vm1066_vm14 = vcmp.gt.f32.partialorder %v1050_v31, 0.0  ;;  %vm1068_vm1 = vcmp.gt.f32.partialorder %v1052_v1, 0.0 }
 0x320   : > { %1239 = vrot.lane.b32.xlu1 %v1223_v38, %s2390_s20  ;;  %1251 = vrot.lane.b32.xlu0 %v1229_v17, %s2390_s20  ;;  %v1048_v38 = vadd.f32 %v2788_v56, %v2776_v8  ;;  %v1097_v17 = vsel %vm1065_vm9, %v1049_v23, %v1081_v20  ;;  %v1099_v21 = vsel %vm1067_vm11, %v1051_v61, %v1083_v22  ;;  %v1082_v8 = vmul.f32 0.01, %v1050_v31 }
 0x322   : > { %v1080_v58 = vmul.f32 0.01, %v1048_v38  ;;  %vm1064_vm12 = vcmp.gt.f32.partialorder %v1048_v38, 0.0 }
 0x324   : > { %1122 = vrot.lane.b32.xlu1 %v1089_v39, %s2391_s21  ;;  %1245 = vrot.lane.b32.xlu0 %v1226_v44, %s2390_s20  ;;  %v1055_v44 = vadd.f32 %v2790_v36, %v2788_v56  ;;  %v1085_v39 = vmul.f32 0.01, %v1053_v16  ;;  %v1096_v26 = vsel %vm1064_vm12, %v1048_v38, %v1080_v58  ;;  %v1054_v36 = vadd.f32 %v2781_v35, %v2788_v56 }
 0x326   : > { %v1101_v59 = vsel %vm1069_vm13, %v1053_v16, %v1085_v39  ;;  %v1087_v25 = vmul.f32 0.01, %v1055_v44  ;;  %vm1071_vm15 = vcmp.gt.f32.partialorder %v1055_v44, 0.0  ;;  %v1086_v47 = vmul.f32 0.01, %v1054_v36 }
 0x327   : > { %vm1070_vm2 = vcmp.gt.f32.partialorder %v1054_v36, 0.0 }
 0x328   : > { %1126 = vrot.lane.b32.xlu1 %v1091_v42, %s2391_s21  ;;  %1241 = vrot.lane.b32.xlu0 %v1224_v45, %s2390_s20  ;;  %v1098_v45 = vsel %vm1066_vm14, %v1050_v31, %v1082_v8  ;;  %v1103_v30 = vsel %vm1071_vm15, %v1055_v44, %v1087_v25  ;;  %v1084_v42 = vmul.f32 0.01, %v1052_v1  ;;  %v1102_v24 = vsel %vm1070_vm2, %v1054_v36, %v1086_v47 }
 0x32a   : > { %v1100_v52 = vsel %vm1068_vm1, %v1052_v1, %v1084_v42 }
 0x32c   : > { %1130 = vrot.lane.b32.xlu1 %v1093_v32, %s2391_s21  ;;  %1120 = vrot.lane.b32.xlu0 %v1088_v34, %s2391_s21 }
 0x330   : > { %1134 = vrot.lane.b32.xlu1 %v1095_v29, %s2391_s21  ;;  %1124 = vrot.lane.b32.xlu0 %v1090_v57, %s2391_s21  ;;  %v2371_v57 = vld [vmem:[%s3268_s4 + $0x8] sm:$0xff]  }
 0x331   : > { %2305 = vmatprep.subr.bf16.mxu1 %v2371_v57 }
 0x332   : > { %2306 = vmatpush3.bf16.msra.mxu1 %v2371_v57 }
 0x334   : > { %1138 = vrot.lane.b32.xlu1 %v1097_v17, %s2391_s21  ;;  %1128 = vrot.lane.b32.xlu0 %v1092_v63, %s2391_s21 }
 0x338   : > { %1142 = vrot.lane.b32.xlu1 %v1099_v21, %s2391_s21  ;;  %1132 = vrot.lane.b32.xlu0 %v1094_v41, %s2391_s21 }
 0x33c   : > { %1136 = vrot.lane.b32.xlu0 %v1096_v26, %s2391_s21  ;;  %1146 = vrot.lane.b32.xlu1 %v1101_v59, %s2391_s21 }
 0x340   : > { %1140 = vrot.lane.b32.xlu0 %v1098_v45, %s2391_s21  ;;  %1150 = vrot.lane.b32.xlu1 %v1103_v30, %s2391_s21 }
 0x344   : > { %1144 = vrot.lane.b32.xlu0 %v1100_v52, %s2391_s21 }
 0x348   : > { %1148 = vrot.lane.b32.xlu0 %v1102_v24, %s2391_s21 }
 0x386   : > { %v1250_v35 = vpop.permute.xlu1 %1249 }
 0x38a   : > { %v1248_v7 = vpop.permute.xlu1 %1247 }
 0x38e   : > { %v1254_v3 = vpop.permute.xlu0 %1253  ;;  %v1244_v32 = vpop.permute.xlu1 %1243 }
 0x38f   : > { %2273 = vmatprep.subr.bf16.mxu0 %v1254_v3 }
 0x390   : > { %2274 = vmatpush3.bf16.msra.mxu0 %v1254_v3 }
 0x392   : > { %v1252_v56 = vpop.permute.xlu0 %1251  ;;  %v1240_v50 = vpop.permute.xlu1 %1239 }
 0x393   : > { %2275 = vmatprep.subr.bf16.mxu0 %v1252_v56 }
 0x394   : > { %2276 = vmatpush3.bf16.msra.mxu0 %v1252_v56 }
 0x395   : > { %2277 = vmatprep.subr.bf16.mxu0 %v1250_v35 }
 0x396   : > { %v1246_v23 = vpop.permute.xlu0 %1245 }
 0x398   : > { %2278 = vmatpush3.bf16.msra.mxu0 %v1250_v35 }
 0x399   : > { %2279 = vmatprep.subr.bf16.mxu0 %v1248_v7 }
 0x39a   : > { %v1242_v34 = vpop.permute.xlu0 %1241 }
 0x39c   : > { %2280 = vmatpush3.bf16.msra.mxu0 %v1248_v7 }
 0x39d   : > { %2281 = vmatprep.subr.bf16.mxu0 %v1246_v23 }
 0x3a0   : > { %2282 = vmatpush3.bf16.msra.mxu0 %v1246_v23 }
 0x3a1   : > { %2283 = vmatprep.subr.bf16.mxu0 %v1244_v32 }
 0x3a4   : > { %2284 = vmatpush3.bf16.msra.mxu0 %v1244_v32 }
 0x3a5   : > { %2285 = vmatprep.subr.bf16.mxu0 %v1242_v34 }
 0x3a8   : > { %2286 = vmatpush3.bf16.msra.mxu0 %v1242_v34 }
 0x3a9   : > { %2287 = vmatprep.subr.bf16.mxu0 %v1240_v50 }
 0x3ac   : > { %2288 = vmatpush3.bf16.msra.mxu0 %v1240_v50 }
 0x3af   : > { %2290 = vmatmul.mubr.bf16.vlgmr.msra.gmra.mxu0 %v2457_v9  ;;  %v2372_v9 = vld [vmem:[%s3268_s4] sm:$0xff]  }
 0x3b0   : > { %2293 = vmatprep.mubr.bf16.mxu0 %v2460_v10  ;;  %2307 = vmatprep.subr.bf16.mxu1 %v2372_v9 }
 0x3b1   : > { %2308 = vmatpush3.bf16.msra.mxu1 %v2372_v9 }
 0x3b7   : > { %2294 = vmatmul.mubr.bf16.gmra.mxu0 %v2465_v11 }
 0x3b8   : > { %2297 = vmatprep.mubr.bf16.mxu0 %v2468_v12 }
 0x3bf   : > { %2298 = vmatmul.mubr.bf16.gmra.mxu0 %v2473_v13 }
 0x3c0   : > { %2301 = vmatprep.mubr.bf16.mxu0 %v2476_v14 }
 0x3c7   : > { %2302 = vmatmul.mubr.bf16.gmra.mxu0 %v2481_v15 }
 0x46f   : > { %v2845_v6 = vpop.f32.mrf.mxu0 }
 0x470   : > { %v1363_v61 = vsel %vm549_vm0, %v2845_v6, 0.0 }
 0x471   : > { %v1297_v10 = vpop.f32.mrf.mxu0 }
 0x472   : > { %v1360_v13 = vsel %vm549_vm0, %v1297_v10, 0.0 }
 0x473   : > { %v2292_v11 = vpop.f32.mrf.mxu0 }
 0x474   : > { %v1365_v63 = vsel %vm549_vm0, %v2292_v11, 0.0 }
 0x475   : > { %v1300_v12 = vpop.f32.mrf.mxu0 }
 0x476   : > { %v1361_v14 = vsel %vm549_vm0, %v1300_v12, 0.0 }
 0x477   : > { %v1362_v15 = vadd.f32 %v1361_v14, %v1360_v13  ;;  %v2855_v33 = vpop.f32.mrf.mxu0 }
 0x478   : > { %v1371_v21 = vsel %vm549_vm0, %v2855_v33, 0.0 }
 0x479   : > { %v1364_v29 = vadd.f32 %v1363_v61, %v1362_v15  ;;  %v1313_v20 = vpop.f32.mrf.mxu0 }
 0x47a   : > { %v1367_v16 = vsel %vm549_vm0, %v1313_v20, 0.0 }
 0x47b   : > { %v1366_v5 = vadd.f32 %v1365_v63, %v1364_v29  ;;  %v2296_v38 = vpop.f32.mrf.mxu0 }
 0x47c   : > { %v1373_v8 = vsel %vm549_vm0, %v2296_v38, 0.0 }
 0x47d   : > { %v1368_v17 = vadd.f32 %v1367_v16, %v1366_v5  ;;  %v1316_v22 = vpop.f32.mrf.mxu0 }
 0x47e   : > { %v1369_v31 = vsel %vm549_vm0, %v1316_v22, 0.0 }
 0x47f   : > { %v1370_v41 = vadd.f32 %v1369_v31, %v1368_v17  ;;  %v2862_v44 = vpop.f32.mrf.mxu0  ;;  %v1401_v17 = vsub.s32 3, %v2550_v40 }
 0x480   : > { %v1379_v52 = vsel %vm549_vm0, %v2862_v44, 0.0 }
 0x481   : > { %v1372_v58 = vadd.f32 %v1371_v21, %v1370_v41  ;;  %v1329_v39 = vpop.f32.mrf.mxu0 }
 0x482   : > { %v1375_v59 = vsel %vm549_vm0, %v1329_v39, 0.0 }
 0x483   : > { %v1374_v1 = vadd.f32 %v1373_v8, %v1372_v58  ;;  %v2867_v26 = vpop.f32.mrf.mxu0 }
 0x484   : > { %v1381_v3 = vsel %vm549_vm0, %v2867_v26, 0.0 }
 0x485   : > { %v1376_v25 = vadd.f32 %v1375_v59, %v1374_v1  ;;  %v1332_v36 = vpop.f32.mrf.mxu0 }
 0x486   : > { %v1377_v45 = vsel %vm549_vm0, %v1332_v36, 0.0 }
 0x487   : > { %v1378_v30 = vadd.f32 %v1377_v45, %v1376_v25  ;;  %v2871_v42 = vpop.f32.mrf.mxu0 }
 0x488   : > { %v1387_v57 = vsel %vm549_vm0, %v2871_v42, 0.0 }
 0x489   : > { %v1380_v47 = vadd.f32 %v1379_v52, %v1378_v30  ;;  %v1345_v24 = vpop.f32.mrf.mxu0 }
 0x48a   : > { %v1383_v7 = vsel %vm549_vm0, %v1345_v24, 0.0 }
 0x48b   : > { %v1382_v35 = vadd.f32 %v1381_v3, %v1380_v47  ;;  %v2877_v56 = vpop.f32.mrf.mxu0 }
 0x48c   : > { %v1389_v13 = vsel %vm549_vm0, %v2877_v56, 0.0 }
 0x48d   : > { %v1384_v23 = vadd.f32 %v1383_v7, %v1382_v35  ;;  %v1348_v32 = vpop.f32.mrf.mxu0 }
 0x48e   : > { %v1385_v34 = vsel %vm549_vm0, %v1348_v32, 0.0 }
 0x48f   : > { %v1386_v50 = vadd.f32 %v1385_v34, %v1384_v23 }
 0x491   : > { %v1388_v9 = vadd.f32 %v1387_v57, %v1386_v50 }
 0x493   : > { %v1390_v14 = vadd.f32 %v1389_v13, %v1388_v9 }
 0x495   : > { %v1391_v15 = vrot.slane %v1390_v14, 4 }
 0x497   : > { %v1392_v61 = vadd.f32 %v1391_v15, %v1390_v14 }
 0x499   : > { %v1393_v29 = vrot.slane %v1392_v61, 2 }
 0x49b   : > { %v1394_v63 = vadd.f32 %v1393_v29, %v1392_v61 }
 0x49d   : > { %v1395_v5 = vrot.slane %v1394_v63, 1 }
 0x49f   : > { %v1396_v16 = vadd.f32 %v1395_v5, %v1394_v63 }
 0x4a1   : > { %v1397_v31 = vmul.f32 0.0078125, %v1396_v16 }
 0x4a3   : > { %v1398_v41 = vmul.f32 %v1397_v31, %v2555_v43 }
 0x4a5   : > { %v1402_v21 = vrot.slane %v1398_v41, %v1401_v17 }
 0x4a7   : > { %v2887_v58 = vsub.f32 %v1297_v10, %v1402_v21  ;;  %v2889_v8 = vsub.f32 %v1300_v12, %v1402_v21  ;;  %v2892_v1 = vsub.f32 %v2845_v6, %v1402_v21  ;;  %v2894_v59 = vsub.f32 %v2292_v11, %v1402_v21 }
 0x4a8   : > { %v2900_v30 = vsub.f32 %v1313_v20, %v1402_v21  ;;  %v2904_v10 = vsub.f32 %v1316_v22, %v1402_v21  ;;  %v2911_v3 = vsub.f32 %v2855_v33, %v1402_v21  ;;  %v2916_v23 = vsub.f32 %v2296_v38, %v1402_v21 }
 0x4a9   : > { %v1419_v25 = vmul.f32 %v2887_v58, %v2887_v58  ;;  %v1420_v45 = vmul.f32 %v2889_v8, %v2889_v8  ;;  %v1421_v52 = vmul.f32 %v2892_v1, %v2892_v1  ;;  %v1422_v12 = vmul.f32 %v2894_v59, %v2894_v59 }
 0x4aa   : > { %v1423_v20 = vmul.f32 %v2900_v30, %v2900_v30  ;;  %v1424_v22 = vmul.f32 %v2904_v10, %v2904_v10  ;;  %v2921_v57 = vsub.f32 %v1329_v39, %v1402_v21  ;;  %v1425_v33 = vmul.f32 %v2911_v3, %v2911_v3 }
 0x4ab   : > { %v1435_v6 = vsel %vm549_vm0, %v1419_v25, 0.0  ;;  %v1436_v11 = vsel %vm549_vm0, %v1420_v45, 0.0  ;;  %v1438_v35 = vsel %vm549_vm0, %v1421_v52, 0.0  ;;  %v1440_v34 = vsel %vm549_vm0, %v1422_v12, 0.0 }
 0x4ac   : > { %v1437_v47 = vadd.f32 %v1436_v11, %v1435_v6  ;;  %v1442_v9 = vsel %vm549_vm0, %v1423_v20, 0.0  ;;  %v2926_v14 = vsub.f32 %v1332_v36, %v1402_v21  ;;  %v1426_v38 = vmul.f32 %v2916_v23, %v2916_v23 }
 0x4ad   : > { %v1444_v15 = vsel %vm549_vm0, %v1424_v22, 0.0  ;;  %v2932_v29 = vsub.f32 %v2862_v44, %v1402_v21  ;;  %v1427_v39 = vmul.f32 %v2921_v57, %v2921_v57  ;;  %v1446_v63 = vsel %vm549_vm0, %v1425_v33, 0.0 }
 0x4ae   : > { %v1439_v7 = vadd.f32 %v1438_v35, %v1437_v47  ;;  %v2938_v16 = vsub.f32 %v2867_v26, %v1402_v21  ;;  %v1428_v36 = vmul.f32 %v2926_v14, %v2926_v14  ;;  %v1448_v17 = vsel %vm549_vm0, %v1426_v38, 0.0 }
 0x4af   : > { %v1415_v41 = vsub.f32 %v1345_v24, %v1402_v21  ;;  %v1429_v44 = vmul.f32 %v2932_v29, %v2932_v29  ;;  %v1450_v25 = vsel %vm549_vm0, %v1427_v39, 0.0  ;;  %v1416_v52 = vsub.f32 %v1348_v32, %v1402_v21 }
 0x4b0   : > { %v1441_v50 = vadd.f32 %v1440_v34, %v1439_v7  ;;  %v1430_v12 = vmul.f32 %v2938_v16, %v2938_v16  ;;  %v1452_v26 = vsel %vm549_vm0, %v1428_v36, 0.0  ;;  %v2950_v11 = vsub.f32 %v2871_v42, %v1402_v21 }
 0x4b1   : > { %v1431_v47 = vmul.f32 %v1415_v41, %v1415_v41  ;;  %v1454_v20 = vsel %vm549_vm0, %v1429_v44, 0.0  ;;  %v2954_v35 = vsub.f32 %v2877_v56, %v1402_v21  ;;  %v1432_v7 = vmul.f32 %v1416_v52, %v1416_v52 }
 0x4b2   : > { %v1443_v13 = vadd.f32 %v1442_v9, %v1441_v50  ;;  %v1456_v22 = vsel %vm549_vm0, %v1430_v12, 0.0  ;;  %v1433_v34 = vmul.f32 %v2950_v11, %v2950_v11 }
 0x4b3   : > { %v1458_v50 = vsel %vm549_vm0, %v1431_v47, 0.0  ;;  %v1434_v42 = vmul.f32 %v2954_v35, %v2954_v35  ;;  %v1460_v9 = vsel %vm549_vm0, %v1432_v7, 0.0 }
 0x4b4   : > { %v1445_v61 = vadd.f32 %v1444_v15, %v1443_v13  ;;  %v1462_v38 = vsel %vm549_vm0, %v1433_v34, 0.0 }
 0x4b5   : > { %v1464_v21 = vsel %vm549_vm0, %v1434_v42, 0.0 }
 0x4b6   : > { %v1447_v5 = vadd.f32 %v1446_v63, %v1445_v61 }
 0x4b8   : > { %v1449_v31 = vadd.f32 %v1448_v17, %v1447_v5 }
 0x4ba   : > { %v1451_v45 = vadd.f32 %v1450_v25, %v1449_v31  ;;  %v1475_v25 = vsub.s32 4, %v2550_v40 }
 0x4bc   : > { %v1453_v6 = vadd.f32 %v1452_v26, %v1451_v45  ;;  %v1513_v45 = vsub.s32 5, %v2550_v40  ;;  %v2968_v12 = vrot.slane %v2555_v43, %v1475_v25 }
 0x4be   : > { %v1455_v24 = vadd.f32 %v1454_v20, %v1453_v6  ;;  %v2971_v26 = vrot.slane %v2555_v43, %v1513_v45  ;;  %v2974_v6 = vmul.f32 %v2968_v12, %v1415_v41  ;;  %v1490_v47 = vmul.f32 %v2968_v12, %v1416_v52 }
 0x4bf   : > { %v1477_v20 = vmul.f32 %v2968_v12, %v2887_v58  ;;  %v1479_v7 = vmul.f32 %v2968_v12, %v2892_v1  ;;  %v1481_v43 = vmul.f32 %v2968_v12, %v2900_v30  ;;  %v1482_v41 = vmul.f32 %v2968_v12, %v2904_v10 }
 0x4c0   : > { %v1457_v32 = vadd.f32 %v1456_v22, %v1455_v24  ;;  %v1478_v24 = vmul.f32 %v2968_v12, %v2889_v8  ;;  %v1480_v22 = vmul.f32 %v2968_v12, %v2894_v59  ;;  %v1483_v58 = vmul.f32 %v2968_v12, %v2911_v3 }
 0x4c1   : > { %v1484_v8 = vmul.f32 %v2968_v12, %v2916_v23  ;;  %v1485_v1 = vmul.f32 %v2968_v12, %v2921_v57  ;;  %v1486_v59 = vmul.f32 %v2968_v12, %v2926_v14  ;;  %v1487_v34 = vmul.f32 %v2968_v12, %v2932_v29 }
 0x4c2   : > { %v1459_v33 = vadd.f32 %v1458_v50, %v1457_v32  ;;  %v1488_v57 = vmul.f32 %v2968_v12, %v2938_v16 }
 0x4c4   : > { %v1461_v13 = vadd.f32 %v1460_v9, %v1459_v33 }
 0x4c6   : > { %v1463_v56 = vadd.f32 %v1462_v38, %v1461_v13 }
 0x4c8   : > { %v1465_v15 = vadd.f32 %v1464_v21, %v1463_v56 }
 0x4ca   : > { %v1466_v61 = vrot.slane %v1465_v15, 4 }
 0x4cc   : > { %v1467_v39 = vadd.f32 %v1466_v61, %v1465_v15 }
 0x4ce   : > { %v1468_v63 = vrot.slane %v1467_v39, 2 }
 0x4d0   : > { %v1469_v5 = vadd.f32 %v1468_v63, %v1467_v39 }
 0x4d2   : > { %v1470_v36 = vrot.slane %v1469_v5, 1 }
 0x4d4   : > { %v1471_v17 = vadd.f32 %v1470_v36, %v1469_v5 }
 0x4d6   : > { %v1472_v31 = vmul.f32 0.0078125, %v1471_v17 }
 0x4d8   : > { %v1493_v44 = vadd.f32 1e-05, %v1472_v31 }
 0x4da   : > { %2379 = vrsqrt.f32 %v1493_v44 }
 0x4e7   : > { %v2989_v32 = vpop.eup %2379 }
 0x4e8   : > { %v1495_v52 = vmul.f32 %v2989_v32, %v1477_v20  ;;  %v1496_v30 = vmul.f32 %v2989_v32, %v1478_v24  ;;  %v1497_v10 = vmul.f32 %v2989_v32, %v1479_v7  ;;  %v1498_v3 = vmul.f32 %v2989_v32, %v1480_v22 }
 0x4e9   : > { %v1499_v50 = vmul.f32 %v2989_v32, %v1481_v43  ;;  %v1500_v23 = vmul.f32 %v2989_v32, %v1482_v41  ;;  %v1508_v14 = vmul.f32 %v2989_v32, %v1490_v47  ;;  %v1501_v56 = vmul.f32 %v2989_v32, %v1483_v58 }
 0x4ea   : > { %v1515_v33 = vadd.f32 %v2971_v26, %v1495_v52  ;;  %v1516_v42 = vadd.f32 %v2971_v26, %v1496_v30  ;;  %v1517_v9 = vadd.f32 %v2971_v26, %v1497_v10  ;;  %v1518_v13 = vadd.f32 %v2971_v26, %v1498_v3 }
 0x4eb   : > { %v1519_v29 = vadd.f32 %v2971_v26, %v1499_v50  ;;  %v1520_v38 = vadd.f32 %v2971_v26, %v1500_v23  ;;  %v1502_v16 = vmul.f32 %v2989_v32, %v1484_v8  ;;  %v1521_v45 = vadd.f32 %v2971_v26, %v1501_v56 }
 0x4ec   : > { %vm1531_vm3 = vcmp.gt.f32.partialorder %v1515_v33, 0.0  ;;  %vm1532_vm4 = vcmp.gt.f32.partialorder %v1516_v42, 0.0  ;;  %v1547_v21 = vmul.f32 0.01, %v1515_v33  ;;  %v1548_v15 = vmul.f32 0.01, %v1516_v42 }
 0x4ed   : > { %vm1533_vm5 = vcmp.gt.f32.partialorder %v1517_v9, 0.0  ;;  %vm1534_vm6 = vcmp.gt.f32.partialorder %v1518_v13, 0.0  ;;  %v1549_v61 = vmul.f32 0.01, %v1517_v9  ;;  %v1550_v63 = vmul.f32 0.01, %v1518_v13 }
 0x4ee   : > { %v3018_v39 = vsel %vm1531_vm3, %v1515_v33, %v1547_v21  ;;  %vm1535_vm7 = vcmp.gt.f32.partialorder %v1519_v29, 0.0  ;;  %vm1536_vm8 = vcmp.gt.f32.partialorder %v1520_v38, 0.0  ;;  %v3020_v5 = vsel %vm1532_vm4, %v1516_v42, %v1548_v15 }
 0x4ef   : > { %v3022_v36 = vsel %vm1533_vm5, %v1517_v9, %v1549_v61  ;;  %v1551_v17 = vmul.f32 0.01, %v1519_v29  ;;  %v1552_v31 = vmul.f32 0.01, %v1520_v38  ;;  %v1579_v44 = vpack.c.bf16 %v3020_v5, %v3018_v39 }
 0x4f0   : > { %v3026_v25 = vsel %vm1534_vm6, %v1518_v13, %v1550_v63  ;;  %v1522_v47 = vadd.f32 %v2971_v26, %v1502_v16  ;;  %v1503_v22 = vmul.f32 %v2989_v32, %v1485_v1  ;;  %vm1537_vm9 = vcmp.gt.f32.partialorder %v1521_v45, 0.0 }
 0x4f1   : > { %v1580_v20 = vpack.c.bf16 %v3026_v25, %v3022_v36  ;;  %v3032_v24 = vsel %vm1535_vm7, %v1519_v29, %v1551_v17  ;;  %v3034_v7 = vsel %vm1536_vm8, %v1520_v38, %v1552_v31  ;;  %2309 = vmatprep.mubr.msk.bf16.mxu1 %vm549_vm0, %v1579_v44  ;;  %v1553_v41 = vmul.f32 0.01, %v1521_v45 }
 0x4f2   : > { %v1581_v43 = vpack.c.bf16 %v3034_v7, %v3032_v24  ;;  %vm1538_vm10 = vcmp.gt.f32.partialorder %v1522_v47, 0.0  ;;  %v1554_v58 = vmul.f32 0.01, %v1522_v47  ;;  %v1504_v8 = vmul.f32 %v2989_v32, %v1486_v59 }
 0x4f3   : > { %2310 = vmatmul.mubr.msk.bf16.vlgmr.msra.gmra.mxu1 %vm549_vm0, %v1580_v20  ;;  %v1523_v52 = vadd.f32 %v2971_v26, %v1503_v22  ;;  %v1505_v30 = vmul.f32 %v2989_v32, %v1487_v34  ;;  %v1506_v1 = vmul.f32 %v2989_v32, %v1488_v57  ;;  %v1507_v10 = vmul.f32 %v2989_v32, %v2974_v6 }
 0x4f4   : > { %2313 = vmatprep.mubr.msk.bf16.mxu1 %vm549_vm0, %v1581_v43  ;;  %v1528_v3 = vadd.f32 %v2971_v26, %v1508_v14  ;;  %v1524_v50 = vadd.f32 %v2971_v26, %v1504_v8  ;;  %v3050_v33 = vsel %vm1537_vm9, %v1521_v45, %v1553_v41  ;;  %v3052_v59 = vsel %vm1538_vm10, %v1522_v47, %v1554_v58  ;;  %v1121_v58 = vpop.permute.xlu0 %1120  ;;  %v1123_v8 = vpop.permute.xlu1 %1122 }
 0x4f5   : > { %vm1539_vm11 = vcmp.gt.f32.partialorder %v1523_v52, 0.0  ;;  %v1555_v23 = vmul.f32 0.01, %v1523_v52  ;;  %v1525_v42 = vadd.f32 %v2971_v26, %v1505_v30  ;;  %v1526_v34 = vadd.f32 %v2971_v26, %v1506_v1 }
 0x4f6   : > { %vm1540_vm12 = vcmp.gt.f32.partialorder %v1524_v50, 0.0  ;;  %v1556_v9 = vmul.f32 0.01, %v1524_v50  ;;  %v1527_v6 = vadd.f32 %v2971_v26, %v1507_v10  ;;  %v1491_v14 = vmul.f32 %v2968_v12, %v2950_v11 }
 0x4f7   : > { %v3056_v57 = vsel %vm1539_vm11, %v1523_v52, %v1555_v23  ;;  %v1492_v13 = vmul.f32 %v2968_v12, %v2954_v35  ;;  %v1582_v29 = vpack.c.bf16 %v3052_v59, %v3050_v33  ;;  %v1557_v56 = vmul.f32 0.01, %v1525_v42 }
 0x4f8   : > { %v3065_v38 = vsel %vm1540_vm12, %v1524_v50, %v1556_v9  ;;  %v1558_v16 = vmul.f32 0.01, %v1526_v34  ;;  %v1509_v15 = vmul.f32 %v2989_v32, %v1491_v14  ;;  %v1560_v63 = vmul.f32 0.01, %v1528_v3  ;;  %v1125_v52 = vpop.permute.xlu0 %1124  ;;  %v1127_v23 = vpop.permute.xlu1 %1126 }
 0x4f9   : > { %v1583_v21 = vpack.c.bf16 %v3065_v38, %v3056_v57  ;;  %v1510_v61 = vmul.f32 %v2989_v32, %v1492_v13  ;;  %vm1541_vm13 = vcmp.gt.f32.partialorder %v1525_v42, 0.0  ;;  %vm1542_vm14 = vcmp.gt.f32.partialorder %v1526_v34, 0.0 }
 0x4fa   : > { %v1559_v11 = vmul.f32 0.01, %v1527_v6  ;;  %vm1543_vm15 = vcmp.gt.f32.partialorder %v1527_v6, 0.0  ;;  %vm1544_vm1 = vcmp.gt.f32.partialorder %v1528_v3, 0.0  ;;  %v3073_v35 = vsel %vm1541_vm13, %v1525_v42, %v1557_v56 }
 0x4fb   : > { %2314 = vmatmul.mubr.msk.bf16.gmra.mxu1 %vm549_vm0, %v1582_v29  ;;  %v3075_v12 = vsel %vm1542_vm14, %v1526_v34, %v1558_v16  ;;  %v1529_v17 = vadd.f32 %v2971_v26, %v1509_v15  ;;  %v1530_v31 = vadd.f32 %v2971_v26, %v1510_v61  ;;  %v3081_v32 = vsel %vm1544_vm1, %v1528_v3, %v1560_v63 }
 0x4fc   : > { %2317 = vmatprep.mubr.msk.bf16.mxu1 %vm549_vm0, %v1583_v21  ;;  %v3079_v44 = vsel %vm1543_vm15, %v1527_v6, %v1559_v11  ;;  %v1584_v45 = vpack.c.bf16 %v3075_v12, %v3073_v35  ;;  %v1168_v30 = vsel %vm549_vm0, %v2696_v18, %v1121_v58  ;;  %vm1184_vm4 = vcmask 523264   ;;  %v1129_v9 = vpop.permute.xlu0 %1128 }
 0x4fd   : > { %v1585_v47 = vpack.c.bf16 %v3081_v32, %v3079_v44  ;;  %v1561_v20 = vmul.f32 0.01, %v1529_v17  ;;  %v1562_v22 = vmul.f32 0.01, %v1530_v31  ;;  %vm1545_vm2 = vcmp.gt.f32.partialorder %v1529_v17, 0.0 }
 0x4fe   : > { %vm1546_vm3 = vcmp.gt.f32.partialorder %v1530_v31, 0.0  ;;  %v1169_v1 = vsel %vm549_vm0, %v2698_v0, %v1123_v8  ;;  %v1170_v10 = vsel %vm549_vm0, %v2700_v54, %v1125_v52  ;;  %v1185_v3 = vsel %vm1184_vm4, %v1168_v30, 0.0  ;;  %v1131_v54 = vpop.permute.xlu1 %1130 }
 0x4ff   : > { %v3089_v43 = vsel %vm1545_vm2, %v1529_v17, %v1561_v20  ;;  %v3091_v26 = vsel %vm1546_vm3, %v1530_v31, %v1562_v22  ;;  %v1186_v50 = vsel %vm1184_vm4, %v1169_v1, 0.0  ;;  %v1188_v42 = vsel %vm1184_vm4, %v1170_v10, 0.0 }
 0x500   : > { %v1586_v41 = vpack.c.bf16 %v3091_v26, %v3089_v43  ;;  %v1187_v34 = vadd.f32 %v1186_v50, %v1185_v3  ;;  %v1171_v6 = vsel %vm549_vm0, %v2704_v4, %v1127_v23  ;;  %v1172_v14 = vsel %vm549_vm0, %v2710_v51, %v1129_v9  ;;  %v1133_v56 = vpop.permute.xlu0 %1132 }
 0x501   : > { %v1190_v0 = vsel %vm1184_vm4, %v1171_v6, 0.0  ;;  %v1192_v29 = vsel %vm1184_vm4, %v1172_v14, 0.0  ;;  %v1173_v21 = vsel %vm549_vm0, %v2712_v19, %v1131_v54  ;;  %v1174_v15 = vsel %vm549_vm0, %v2728_v53, %v1133_v56  ;;  %v2381_v6 = vld [vmem:[%s3270_s6] sm:$0xff] }
 0x502   : > { %v1189_v18 = vadd.f32 %v1188_v42, %v1187_v34  ;;  %v1194_v4 = vsel %vm1184_vm4, %v1173_v21, 0.0  ;;  %v1135_v63 = vpop.permute.xlu1 %1134  ;;  %v1196_v51 = vsel %vm1184_vm4, %v1174_v15, 0.0  ;;  %v1593_v23 = vsub.s32 7, %v2550_v40 }
 0x503   : > { %2318 = vmatmul.mubr.msk.bf16.gmra.mxu1 %vm549_vm0, %v1584_v45  ;;  %v1175_v17 = vsel %vm549_vm0, %v2730_v55, %v1135_v63 }
 0x504   : > { %2321 = vmatprep.mubr.msk.bf16.mxu1 %vm549_vm0, %v1585_v47  ;;  %v1191_v13 = vadd.f32 %v1190_v0, %v1189_v18  ;;  %v1137_v11 = vpop.permute.xlu0 %1136  ;;  %v1198_v19 = vsel %vm1184_vm4, %v1175_v17, 0.0  ;;  %v3139_v18 = vrot.slane %v2381_v6, %v1593_v23 }
 0x505   : > { %v1176_v45 = vsel %vm549_vm0, %v2734_v62, %v1137_v11 }
 0x506   : > { %v1193_v16 = vadd.f32 %v1192_v29, %v1191_v13  ;;  %v1139_v20 = vpop.permute.xlu1 %1138  ;;  %v1200_v53 = vsel %vm1184_vm4, %v1176_v45, 0.0 }
 0x508   : > { %v1195_v61 = vadd.f32 %v1194_v4, %v1193_v16  ;;  %v1141_v22 = vpop.permute.xlu0 %1140 }
 0x509   : > { %v1178_v8 = vsel %vm549_vm0, %v2751_v49, %v1141_v22 }
 0x50a   : > { %v1197_v31 = vadd.f32 %v1196_v51, %v1195_v61  ;;  %v1143_v30 = vpop.permute.xlu1 %1142  ;;  %v1204_v62 = vsel %vm1184_vm4, %v1178_v8, 0.0 }
 0x50b   : > { %2322 = vmatmul.mubr.msk.bf16.gmra.mxu1 %vm549_vm0, %v1586_v41  ;;  %v1177_v41 = vsel %vm549_vm0, %v2743_v60, %v1139_v20  ;;  %v1179_v10 = vsel %vm549_vm0, %v2753_v2, %v1143_v30 }
 0x50c   : > { %v1199_v47 = vadd.f32 %v1198_v19, %v1197_v31  ;;  %v1202_v55 = vsel %vm1184_vm4, %v1177_v41, 0.0  ;;  %v1145_v1 = vpop.permute.xlu0 %1144  ;;  %v1206_v60 = vsel %vm1184_vm4, %v1179_v10, 0.0 }
 0x50d   : > { %v1180_v50 = vsel %vm549_vm0, %v2757_v27, %v1145_v1 }
 0x50e   : > { %v1201_v58 = vadd.f32 %v1200_v53, %v1199_v47  ;;  %v1147_v49 = vpop.permute.xlu1 %1146  ;;  %v1208_v34 = vsel %vm1184_vm4, %v1180_v50, 0.0 }
 0x50f   : > { %v1181_v2 = vsel %vm549_vm0, %v2759_v37, %v1147_v49  ;;  %v2373_v49 = vld [vmem:[%s3269_s5 + $0x18] sm:$0xff]  }
 0x510   : > { %v1203_v52 = vadd.f32 %v1202_v55, %v1201_v58  ;;  %v1149_v9 = vpop.permute.xlu0 %1148  ;;  %v1210_v13 = vsel %vm1184_vm4, %v1181_v2, 0.0 }
 0x511   : > { %v1182_v27 = vsel %vm549_vm0, %v2767_v46, %v1149_v9 }
 0x512   : > { %v1205_v3 = vadd.f32 %v1204_v62, %v1203_v52  ;;  %v1151_v21 = vpop.permute.xlu1 %1150  ;;  %v1212_v16 = vsel %vm1184_vm4, %v1182_v27, 0.0 }
 0x513   : > { %v1183_v37 = vsel %vm549_vm0, %v2769_v28, %v1151_v21 }
 0x514   : > { %v1207_v42 = vadd.f32 %v1206_v60, %v1205_v3  ;;  %v1214_v19 = vsel %vm1184_vm4, %v1183_v37, 0.0 }
 0x516   : > { %v1209_v14 = vadd.f32 %v1208_v34, %v1207_v42 }
 0x518   : > { %v1211_v54 = vadd.f32 %v1210_v13, %v1209_v14  ;;  %v2392_v13 = vmov 0.0  }
 0x519   : > { %2325 = vmatprep.subr.bf16.mxu0 %v2392_v13 }
 0x51a   : > { %v1213_v63 = vadd.f32 %v1212_v16, %v1211_v54  ;;  %2326 = vmatpush3.bf16.msra.mxu0 %v2373_v49 }
 0x51b   : > { %2327 = vmatprep.subr.bf16.mxu0 %v2392_v13 }
 0x51c   : > { %v1215_v20 = vadd.f32 %v1214_v19, %v1213_v63 }
 0x51e   : > { %v1216_v30 = vrot.slane %v1215_v20, 4 }
 0x520   : > { %v1217_v34 = vadd.f32 %v1216_v30, %v1215_v20 }
 0x5b3   : > { %v2311_v0 = vpop.f32.mrf.mxu1 }
 0x5b4   : > { %v1674_v29 = vadd.f32 %v2311_v0, %v3139_v18 }
 0x5b5   : > { %v1665_v56 = vpop.f32.mrf.mxu1 }
 0x5b6   : > { %v1666_v15 = vadd.f32 %v1665_v56, %v3139_v18  ;;  %v1746_v46 = vmul.f32 0.01, %v1674_v29  ;;  %vm1730_vm6 = vcmp.gt.f32.partialorder %v1674_v29, 0.0 }
 0x5b7   : > { %v2312_v4 = vpop.f32.mrf.mxu1 }
 0x5b8   : > { %v1744_v61 = vmul.f32 0.01, %v1666_v15  ;;  %vm1728_vm5 = vcmp.gt.f32.partialorder %v1666_v15, 0.0  ;;  %v1677_v51 = vadd.f32 %v2312_v4, %v3139_v18  ;;  %v1762_v28 = vsel %vm1730_vm6, %v1674_v29, %v1746_v46 }
 0x5b9   : > { %v1668_v11 = vpop.f32.mrf.mxu1 }
 0x5ba   : > { %v1669_v17 = vadd.f32 %v1668_v11, %v3139_v18  ;;  %v1760_v31 = vsel %vm1728_vm5, %v1666_v15, %v1744_v61  ;;  %v1747_v53 = vmul.f32 0.01, %v1677_v51  ;;  %vm1731_vm8 = vcmp.gt.f32.partialorder %v1677_v51, 0.0 }
 0x5bb   : > { %v2315_v45 = vpop.f32.mrf.mxu1  ;;  %1792 = vrot.lane.b32.xlu0 %v1760_v31, %s2391_s21  ;;  %v1218_v15 = vrot.slane %v1217_v34, 2 }
 0x5bc   : > { %v1745_v47 = vmul.f32 0.01, %v1669_v17  ;;  %vm1729_vm7 = vcmp.gt.f32.partialorder %v1669_v17, 0.0  ;;  %v1690_v41 = vadd.f32 %v2315_v45, %v3139_v18  ;;  %v1763_v1 = vsel %vm1731_vm8, %v1677_v51, %v1747_v53  ;;  %v2374_v51 = vld [vmem:[%s3269_s5 + $0x10] sm:$0xff]  }
 0x5bd   : > { %v1681_v22 = vpop.f32.mrf.mxu1  ;;  %v1219_v45 = vadd.f32 %v1218_v15, %v1217_v34  ;;  %2328 = vmatpush3.bf16.msra.mxu0 %v2374_v51 }
 0x5be   : > { %v1682_v58 = vadd.f32 %v1681_v22, %v3139_v18  ;;  %v1761_v8 = vsel %vm1729_vm7, %v1669_v17, %v1745_v47  ;;  %v1750_v10 = vmul.f32 0.01, %v1690_v41  ;;  %vm1734_vm10 = vcmp.gt.f32.partialorder %v1690_v41, 0.0  ;;  %2329 = vmatprep.subr.bf16.mxu0 %v2392_v13 }
 0x5bf   : > { %v2316_v55 = vpop.f32.mrf.mxu1  ;;  %1796 = vrot.lane.b32.xlu0 %v1762_v28, %s2391_s21  ;;  %1794 = vrot.lane.b32.xlu1 %v1761_v8, %s2391_s21  ;;  %vm2394_vm7 = vmmov 0  }
 0x5c0   : > { %v1748_v52 = vmul.f32 0.01, %v1682_v58  ;;  %vm1732_vm9 = vcmp.gt.f32.partialorder %v1682_v58, 0.0  ;;  %v1693_v3 = vadd.f32 %v2316_v55, %v3139_v18  ;;  %v1766_v27 = vsel %vm1734_vm10, %v1690_v41, %v1750_v10  ;;  %2333 = vmatprep.mubr.msk.bf16.mxu0 %vm2394_vm7, %v2392_v13 }
 0x5c1   : > { %v1684_v62 = vpop.f32.mrf.mxu1  ;;  %vm1997_vm10 = vcmask 785408  }
 0x5c2   : > { %v1685_v50 = vadd.f32 %v1684_v62, %v3139_v18  ;;  %v1764_v60 = vsel %vm1732_vm9, %v1682_v58, %v1748_v52  ;;  %v1751_v2 = vmul.f32 0.01, %v1693_v3  ;;  %vm1735_vm12 = vcmp.gt.f32.partialorder %v1693_v3, 0.0 }
 0x5c3   : > { %v2319_v23 = vpop.f32.mrf.mxu1  ;;  %1800 = vrot.lane.b32.xlu0 %v1764_v60, %s2391_s21  ;;  %1798 = vrot.lane.b32.xlu1 %v1763_v1, %s2391_s21  ;;  %v1220_v58 = vrot.slane %v1219_v45, 1  ;;  %v2375_v60 = vld [vmem:[%s3269_s5 + $0x8] sm:$0xff]   ;;  %vm1991_vm9 = vcmask 392192  }
 0x5c4   : > { %v1749_v42 = vmul.f32 0.01, %v1685_v50  ;;  %vm1733_vm11 = vcmp.gt.f32.partialorder %v1685_v50, 0.0  ;;  %v1706_v9 = vadd.f32 %v2319_v23, %v3139_v18  ;;  %v1767_v37 = vsel %vm1735_vm12, %v1693_v3, %v1751_v2  ;;  %2330 = vmatpush3.bf16.msra.mxu0 %v2375_v60 }
 0x5c5   : > { %v1697_v6 = vpop.f32.mrf.mxu1  ;;  %v1221_v1 = vadd.f32 %v1220_v58, %v1219_v45  ;;  %2331 = vmatprep.subr.bf16.mxu0 %v2392_v13 }
 0x5c6   : > { %v1698_v14 = vadd.f32 %v1697_v6, %v3139_v18  ;;  %v1765_v0 = vsel %vm1733_vm11, %v1685_v50, %v1749_v42  ;;  %v1754_v56 = vmul.f32 0.01, %v1706_v9  ;;  %vm1738_vm14 = vcmp.gt.f32.partialorder %v1706_v9, 0.0 }
 0x5c7   : > { %v2320_v54 = vpop.f32.mrf.mxu1  ;;  %1804 = vrot.lane.b32.xlu0 %v1766_v27, %s2391_s21  ;;  %1802 = vrot.lane.b32.xlu1 %v1765_v0, %s2391_s21  ;;  %v1222_v23 = vmul.f32 0.0078125, %v1221_v1 }
 0x5c8   : > { %v1752_v29 = vmul.f32 0.01, %v1698_v14  ;;  %vm1736_vm13 = vcmp.gt.f32.partialorder %v1698_v14, 0.0  ;;  %v1709_v21 = vadd.f32 %v2320_v54, %v3139_v18  ;;  %v1770_v31 = vsel %vm1738_vm14, %v1706_v9, %v1754_v56 }
 0x5c9   : > { %v1700_v16 = vpop.f32.mrf.mxu1 }
 0x5ca   : > { %v1701_v4 = vadd.f32 %v1700_v16, %v3139_v18  ;;  %v1768_v61 = vsel %vm1736_vm13, %v1698_v14, %v1752_v29  ;;  %v1755_v11 = vmul.f32 0.01, %v1709_v21  ;;  %vm1739_vm1 = vcmp.gt.f32.partialorder %v1709_v21, 0.0 }
 0x5cb   : > { %v2323_v63 = vpop.f32.mrf.mxu1  ;;  %1808 = vrot.lane.b32.xlu0 %v1768_v61, %s2391_s21  ;;  %1806 = vrot.lane.b32.xlu1 %v1767_v37, %s2391_s21 }
 0x5cc   : > { %v1753_v46 = vmul.f32 0.01, %v1701_v4  ;;  %vm1737_vm15 = vcmp.gt.f32.partialorder %v1701_v4, 0.0  ;;  %v1722_v19 = vadd.f32 %v2323_v63, %v3139_v18  ;;  %v1771_v41 = vsel %vm1739_vm1, %v1709_v21, %v1755_v11 }
 0x5cd   : > { %v1713_v17 = vpop.f32.mrf.mxu1 }
 0x5ce   : > { %v1714_v47 = vadd.f32 %v1713_v17, %v3139_v18  ;;  %v1769_v20 = vsel %vm1737_vm15, %v1701_v4, %v1753_v46  ;;  %v1758_v8 = vmul.f32 0.01, %v1722_v19  ;;  %vm1742_vm3 = vcmp.gt.f32.partialorder %v1722_v19, 0.0 }
 0x5cf   : > { %v2324_v53 = vpop.f32.mrf.mxu1  ;;  %1812 = vrot.lane.b32.xlu0 %v1770_v31, %s2391_s21  ;;  %1810 = vrot.lane.b32.xlu1 %v1769_v20, %s2391_s21 }
 0x5d0   : > { %v1756_v22 = vmul.f32 0.01, %v1714_v47  ;;  %vm1740_vm2 = vcmp.gt.f32.partialorder %v1714_v47, 0.0  ;;  %v1725_v55 = vadd.f32 %v2324_v53, %v3139_v18  ;;  %v1774_v3 = vsel %vm1742_vm3, %v1722_v19, %v1758_v8 }
 0x5d1   : > { %v1716_v28 = vpop.f32.mrf.mxu1 }
 0x5d2   : > { %v1717_v52 = vadd.f32 %v1716_v28, %v3139_v18  ;;  %v1772_v30 = vsel %vm1740_vm2, %v1714_v47, %v1756_v22  ;;  %v1759_v10 = vmul.f32 0.01, %v1725_v55  ;;  %vm1743_vm6 = vcmp.gt.f32.partialorder %v1725_v55, 0.0  ;;  %v2376_v18 = vld [vmem:[%s3269_s5] sm:$0xff]  }
 0x5d3   : > { %1816 = vrot.lane.b32.xlu0 %v1772_v30, %s2391_s21  ;;  %1814 = vrot.lane.b32.xlu1 %v1771_v41, %s2391_s21 }
 0x5d4   : > { %v1757_v62 = vmul.f32 0.01, %v1717_v52  ;;  %vm1741_vm5 = vcmp.gt.f32.partialorder %v1717_v52, 0.0  ;;  %v1775_v42 = vsel %vm1743_vm6, %v1725_v55, %v1759_v10  ;;  %2332 = vmatpush3.bf16.msra.mxu0 %v2376_v18 }
 0x5d6   : > { %v1773_v50 = vsel %vm1741_vm5, %v1717_v52, %v1757_v62 }
 0x5d7   : > { %1820 = vrot.lane.b32.xlu0 %v1774_v3, %s2391_s21  ;;  %1818 = vrot.lane.b32.xlu1 %v1773_v50, %s2391_s21 }
 0x5db   : > { %1822 = vrot.lane.b32.xlu1 %v1775_v42, %s2391_s21  ;;  %1895 = vrot.lane.b32.xlu0 %v1222_v23, %s2390_s20 }
 0x5df   : > { %1978 = vrot.lane.b32.xlu1 %v1222_v23, %s2393_s15 }
 0x62d   : > { %v1793_v49 = vpop.permute.xlu0 %1792 }
 0x62e   : > { %v1840_v34 = vsel %vm549_vm0, %v3018_v39, %v1793_v49 }
 0x62f   : > { %v1856_v27 = vsel %vm1184_vm4, %v1840_v34, 0.0 }
 0x631   : > { %v1797_v9 = vpop.permute.xlu0 %1796  ;;  %v1795_v6 = vpop.permute.xlu1 %1794 }
 0x632   : > { %v1842_v2 = vsel %vm549_vm0, %v3022_v36, %v1797_v9  ;;  %v1841_v14 = vsel %vm549_vm0, %v3020_v5, %v1795_v6 }
 0x633   : > { %v1857_v0 = vsel %vm1184_vm4, %v1841_v14, 0.0  ;;  %v1859_v29 = vsel %vm1184_vm4, %v1842_v2, 0.0 }
 0x634   : > { %v1858_v54 = vadd.f32 %v1857_v0, %v1856_v27 }
 0x635   : > { %v1801_v13 = vpop.permute.xlu0 %1800  ;;  %v1799_v56 = vpop.permute.xlu1 %1798 }
 0x636   : > { %v1844_v39 = vsel %vm549_vm0, %v3032_v24, %v1801_v13  ;;  %v1860_v21 = vadd.f32 %v1859_v29, %v1858_v54  ;;  %v1843_v16 = vsel %vm549_vm0, %v3026_v25, %v1799_v56 }
 0x637   : > { %v1861_v36 = vsel %vm1184_vm4, %v1843_v16, 0.0  ;;  %v1863_v5 = vsel %vm1184_vm4, %v1844_v39, 0.0 }
 0x638   : > { %v1862_v15 = vadd.f32 %v1861_v36, %v1860_v21 }
 0x639   : > { %v1805_v4 = vpop.permute.xlu0 %1804  ;;  %v1803_v61 = vpop.permute.xlu1 %1802 }
 0x63a   : > { %v1846_v37 = vsel %vm549_vm0, %v3050_v33, %v1805_v4  ;;  %v1864_v63 = vadd.f32 %v1863_v5, %v1862_v15  ;;  %v1845_v46 = vsel %vm549_vm0, %v3034_v7, %v1803_v61 }
 0x63b   : > { %v1865_v24 = vsel %vm1184_vm4, %v1845_v46, 0.0  ;;  %v1867_v11 = vsel %vm1184_vm4, %v1846_v37, 0.0 }
 0x63c   : > { %v1866_v51 = vadd.f32 %v1865_v24, %v1864_v63 }
 0x63d   : > { %v1809_v25 = vpop.permute.xlu0 %1808  ;;  %v1807_v17 = vpop.permute.xlu1 %1806 }
 0x63e   : > { %v1848_v31 = vsel %vm549_vm0, %v3056_v57, %v1809_v25  ;;  %v1868_v45 = vadd.f32 %v1867_v11, %v1866_v51  ;;  %v1847_v19 = vsel %vm549_vm0, %v3052_v59, %v1807_v17 }
 0x63f   : > { %v1869_v33 = vsel %vm1184_vm4, %v1847_v19, 0.0  ;;  %v1871_v20 = vsel %vm1184_vm4, %v1848_v31, 0.0 }
 0x640   : > { %v1870_v47 = vadd.f32 %v1869_v33, %v1868_v45 }
 0x641   : > { %v1813_v7 = vpop.permute.xlu0 %1812  ;;  %v1811_v53 = vpop.permute.xlu1 %1810 }
 0x642   : > { %v1850_v22 = vsel %vm549_vm0, %v3073_v35, %v1813_v7  ;;  %v1872_v28 = vadd.f32 %v1871_v20, %v1870_v47  ;;  %v1849_v41 = vsel %vm549_vm0, %v3065_v38, %v1811_v53 }
 0x643   : > { %v1873_v57 = vsel %vm1184_vm4, %v1849_v41, 0.0  ;;  %v1875_v8 = vsel %vm1184_vm4, %v1850_v22, 0.0 }
 0x644   : > { %v1874_v58 = vadd.f32 %v1873_v57, %v1872_v28 }
 0x645   : > { %v1817_v59 = vpop.permute.xlu0 %1816  ;;  %v1815_v55 = vpop.permute.xlu1 %1814 }
 0x646   : > { %v1852_v52 = vsel %vm549_vm0, %v3079_v44, %v1817_v59  ;;  %v1876_v30 = vadd.f32 %v1875_v8, %v1874_v58  ;;  %v1851_v62 = vsel %vm549_vm0, %v3075_v12, %v1815_v55 }
 0x647   : > { %v1877_v35 = vsel %vm1184_vm4, %v1851_v62, 0.0  ;;  %v1879_v10 = vsel %vm1184_vm4, %v1852_v52, 0.0 }
 0x648   : > { %v1878_v1 = vadd.f32 %v1877_v35, %v1876_v30 }
 0x649   : > { %v1821_v38 = vpop.permute.xlu0 %1820  ;;  %v1819_v3 = vpop.permute.xlu1 %1818 }
 0x64a   : > { %v1854_v50 = vsel %vm549_vm0, %v3089_v43, %v1821_v38  ;;  %v1880_v60 = vadd.f32 %v1879_v10, %v1878_v1  ;;  %v1853_v18 = vsel %vm549_vm0, %v3081_v32, %v1819_v3 }
 0x64b   : > { %v1881_v44 = vsel %vm1184_vm4, %v1853_v18, 0.0  ;;  %v1883_v42 = vsel %vm1184_vm4, %v1854_v50, 0.0 }
 0x64c   : > { %v1882_v23 = vadd.f32 %v1881_v44, %v1880_v60 }
 0x64d   : > { %v1823_v12 = vpop.permute.xlu1 %1822  ;;  %v1896_v29 = vpop.permute.xlu0 %1895 }
 0x64e   : > { %v1884_v49 = vadd.f32 %v1883_v42, %v1882_v23  ;;  %v1855_v34 = vsel %vm549_vm0, %v3091_v26, %v1823_v12  ;;  %v331_v26 = vld [vmem:[%s3270_s6 + $0x8] sm:$0x1] }
 0x64f   : > { %v1885_v9 = vsel %vm1184_vm4, %v1855_v34, 0.0 }
 0x650   : > { %v1886_v6 = vadd.f32 %v1885_v9, %v1884_v49 }
 0x651   : > { %v1979_v61 = vpop.permute.xlu1 %1978 }
 0x652   : > { %v1887_v2 = vrot.slane %v1886_v6, 4 }
 0x654   : > { %v1888_v14 = vadd.f32 %v1887_v2, %v1886_v6 }
 0x656   : > { %v1889_v43 = vrot.slane %v1888_v14, 2 }
 0x658   : > { %v1890_v27 = vadd.f32 %v1889_v43, %v1888_v14 }
 0x65a   : > { %v1891_v0 = vrot.slane %v1890_v27, 1 }
 0x65c   : > { %v1892_v54 = vadd.f32 %v1891_v0, %v1890_v27 }
 0x65e   : > { %v1893_v32 = vmul.f32 0.0078125, %v1892_v54 }
 0x660   : > { %1986 = vrot.lane.b32.xlu1 %v1893_v32, %s2395_s16  ;;  %v1898_v13 = vsel %vm549_vm0, %v1896_v29, %v1893_v32  ;;  %vm1989_vm0 = vcmask 130048  }
 0x661   : > { %v1899_v56 = vpack.c.bf16 %v1898_v13, %v1898_v13 }
 0x663   : > { %2334 = vmatmul.mubr.msk.bf16.vlgmr.msra.gmra.mxu0 %vm1184_vm4, %v1899_v56 }
 0x6d2   : > { %v1987_v46 = vpop.permute.xlu1 %1986 }
 0x723   : > { %v1969_v39 = vpop.f32.mrf.mxu0 }
 0x724   : > { %v1970_v21 = vadd.f32 %v1969_v39, %v331_v26 }
 0x725   : > { %v2335_v16 = vpop.f32.mrf.mxu0 }
 0x726   : > { %v1976_v36 = vmul.f32 0.01, %v1970_v21  ;;  %vm1975_vm8 = vcmp.gt.f32.partialorder %v1970_v21, 0.0 }
 0x727   : > { %v1972_v15 = vpop.f32.mrf.mxu0 }
 0x728   : > { %v1977_v5 = vsel %vm1975_vm8, %v1970_v21, %v1976_v36 }
 0x729   : > { %1982 = vrot.lane.b32.xlu0 %v1977_v5, %s2391_s21  ;;  %v2336_v4 = vpop.f32.mrf.mxu0  ;;  %v1990_v63 = vsel %vm1989_vm0, %v1977_v5, %v1979_v61 }
 0x79b   : > { %v1983_v37 = vpop.permute.xlu0 %1982 }
 0x79c   : > { %v1992_v24 = vsel %vm1991_vm9, %v1990_v63, %v1983_v37 }
 0x79d   : > { %v1993_v51 = vsel %vm1184_vm4, %v1992_v24, %v1987_v46 }
 0x79e   : > { %vm1994_vm11 = vcmp.gt.f32.partialorder %v1993_v51, 0.0  ;;  %v1995_v11 = vmul.f32 0.01, %v1993_v51 }
 0x7a0   : > { %v1996_v25 = vsel %vm1994_vm11, %v1993_v51, %v1995_v11 }
 0x7a1   : > { %v1998_v17 = vsel %vm1997_vm10, %v1996_v25, 0.0 }
 0x7a2   : > { %v2002_v31 = vrot.slane %v1998_v17, %v713_v48 }
 0x7a4   : > { %2003 = vst [vmem:[%s296_s23] sm:$0xff] %v2002_v31 }
 0x7a5 PF: > { %s17_s24 = sadd.s32 1, %s2388_s24  }
 0x7a6   : > { %p14_p4 = scmp.ge.s32.totalorder %s17_s24, 4  }
 0x7a8   :  { %16 = sbr.rel (!%p14_p4) target bundleno = 1 (0x1), region = 81 }

</bundles_post_ra>
